<compile_context>
chip_gen: v6e
topology: v6e:2x2x1
jax: 0.10.0
libtpu: 0.0.40
codegen_flags: <defaults>
</compile_context>

<pallas_src>
import functools

import jax
import jax.numpy as jnp
from jax.experimental import pallas as pl
from jax.experimental.pallas import tpu as pltpu


# ----------------------------------------------------------------------------
# Fused kernel: bidir LSTM layer 0 -> bidir LSTM layer 1 -> compress MLP
# ----------------------------------------------------------------------------
def lstm_compressor_kernel(
    x_ref,      # (T, B_pad, D_pad)  bf16, time-major, batch padded to 8 sublanes
    w_ref,      # (D_pad + 4H, 8H)   bf16 slab: [Wih0; Whh0; Wih1; Whh1], fwd cols [0,4H) / bwd [4H,8H)
    wh_ref,     # (3H, H)            bf16 slab: [W1^T (2H rows); W2^T (H rows)]
    b_ref,      # (4, 8H)            f32 slab:  [b0; b1; bm1(pad); bm2(pad)]
    o_ref,      # (B_pad, H)         f32 output
    *, hidden: int,
):
    T, Bp, Dp = x_ref.shape
    H = hidden
    G = 4 * H

    # ---- static weight views from the packed slabs --------------------------
    wih0 = w_ref[0:Dp, :]                       # (Dp, 8H)
    whh0 = w_ref[Dp:Dp + H, :]                  # (H, 8H)  [Whh_f | Whh_b]
    wih1_f = w_ref[Dp + H:Dp + 2 * H, :]        # (H, 8H)  layer-1 W_ih rows for fwd features
    wih1_b = w_ref[Dp + 2 * H:Dp + 3 * H, :]    # (H, 8H)  layer-1 W_ih rows for bwd features
    whh1 = w_ref[Dp + 3 * H:Dp + 4 * H, :]      # (H, 8H)
    b0 = b_ref[0:1, :]
    b1 = b_ref[1:2, :]
    bm1 = b_ref[2:3, 0:H]
    bm2 = b_ref[3:4, 0:H]

    def run_layer(xp, whh, collect):
        """One bidirectional LSTM layer with the two directions fused.

        xp: (T, Bp, 8H) f32 pre-projected gates (bias folded; fwd cols [0,4H), bwd [4H,8H)).
        whh: (H, 8H) bf16 = [Whh_f | Whh_b].  State rows [0,Bp) = forward, [Bp,2Bp) = backward,
        so a single (2Bp,H)@(H,8H) MXU push per step serves both recurrences.
        """
        h = jnp.zeros((2 * Bp, H), jnp.bfloat16)   # h carried in bf16 (matmul operand dtype)
        c = jnp.zeros((2 * Bp, H), jnp.float32)
        hf_steps, hb_steps = [], []
        for i in range(T):                          # static unroll: T small & known at trace time
            tf, tb = i, T - 1 - i
            g_rec = jnp.dot(h, whh, preferred_element_type=jnp.float32)        # (2Bp, 8H)
            gates = jnp.concatenate(
                [xp[tf][:, 0:G] + g_rec[0:Bp, 0:G],
                 xp[tb][:, G:2 * G] + g_rec[Bp:2 * Bp, G:2 * G]], axis=0)       # (2Bp, 4H) f32
            # PyTorch gate order i | f | g | o.  One full-width sigmoid (i,f,o) + tanh for g.
            sig = jax.nn.sigmoid(gates)
            g_g = jnp.tanh(gates[:, 2 * H:3 * H])
            c = sig[:, H:2 * H] * c + sig[:, 0:H] * g_g
            h = (sig[:, 3 * H:G] * jnp.tanh(c)).astype(jnp.bfloat16)
            if collect:
                hf_steps.append(h[0:Bp, :])         # fwd hidden at time tf
                hb_steps.append(h[Bp:2 * Bp, :])    # bwd hidden at time tb
        return h, hf_steps, hb_steps

    # ---- layer 0: hoisted input projection (one big MXU matmul) -------------
    x2 = x_ref[...].reshape(T * Bp, Dp)
    xp0 = (jnp.dot(x2, wih0, preferred_element_type=jnp.float32) + b0).reshape(T, Bp, 2 * G)
    _, hf0, hb0 = run_layer(xp0, whh0, collect=True)
    # TODO(synk): inter-layer LSTM dropout (train mode) omitted — eval semantics (identity).

    # ---- layer 1: hoisted input projection over layer-0 outputs (no scratch) -
    y_f = jnp.concatenate(hf0, axis=0)              # (T*Bp, H) bf16, time-major fwd outputs
    y_b = jnp.concatenate(hb0[::-1], axis=0)        # (T*Bp, H) bf16, time-major bwd outputs
    xp1 = (jnp.dot(y_f, wih1_f, preferred_element_type=jnp.float32)
           + jnp.dot(y_b, wih1_b, preferred_element_type=jnp.float32)
           + b1).reshape(T, Bp, 2 * G)
    h1, _, _ = run_layer(xp1, whh1, collect=False)
    hf1 = h1[0:Bp, :]                               # == hidden[-2] (last-layer fwd final state)
    hb1 = h1[Bp:2 * Bp, :]                          # == hidden[-1] (last-layer bwd final state)

    # ---- compress head: Linear(2H->H) -> ReLU -> (Dropout=id) -> Linear(H->H)
    # cat([hf1, hb1]) @ W1^T computed as a split matmul (no lane concat needed).
    z = (jnp.dot(hf1, wh_ref[0:H, :], preferred_element_type=jnp.float32)
         + jnp.dot(hb1, wh_ref[H:2 * H, :], preferred_element_type=jnp.float32)
         + bm1)
    z = jnp.maximum(z, 0.0)
    o = jnp.dot(z.astype(jnp.bfloat16), wh_ref[2 * H:3 * H, :],
                preferred_element_type=jnp.float32) + bm2
    o_ref[...] = o.astype(o_ref.dtype)


# ----------------------------------------------------------------------------
# Wrapper
# ----------------------------------------------------------------------------
_VMEM = pl.BlockSpec(memory_space=pltpu.MemorySpace.VMEM)


def lstm_compressor_forward(x, params):
    """x: (B, T, D) batch-first, like the PyTorch module. Returns (B, H) f32."""
    B, T, D = x.shape
    w_slab, head_slab, bias_slab = params["w_slab"], params["head_slab"], params["bias_slab"]
    H = head_slab.shape[1]
    Dp = w_slab.shape[0] - 4 * H
    Bp = ((B + 7) // 8) * 8                     # pad batch to a full sublane tile

    # time-major, batch/feature padded; bf16 matmul operand (accumulation stays f32).
    # TODO(synk): accept time-major input upstream to skip this small extra HBM roundtrip.
    x_tm = jnp.transpose(x, (1, 0, 2))
    x_tm = jnp.pad(x_tm, ((0, 0), (0, Bp - B), (0, Dp - D))).astype(jnp.bfloat16)

    kernel = functools.partial(lstm_compressor_kernel, hidden=H)
    out = pl.pallas_call(
        kernel,
        out_shape=jax.ShapeDtypeStruct((Bp, H), jnp.float32),
        in_specs=[_VMEM] * 4,
        out_specs=_VMEM,
        compiler_params=pltpu.CompilerParams(vmem_limit_bytes=32 * 1024 * 1024),
    )(x_tm, w_slab, head_slab, bias_slab)
    return out[:B]


# ----------------------------------------------------------------------------
# Deterministic parameter init (PyTorch-like uniform(-1/sqrt(H), 1/sqrt(H))),
# packed into 3 flat slabs so the kernel prologue issues 3 DMAs instead of 13.
# ----------------------------------------------------------------------------
def init_params(key, input_dim, hidden_dim):
    H = hidden_dim
    assert H % 8 == 0, "hidden_dim must be a multiple of 8"
    Dp = ((input_dim + 7) // 8) * 8
    bound = 1.0 / jnp.sqrt(jnp.float32(H))
    keys = iter(jax.random.split(key, 32))

    def uni(shape):
        return jax.random.uniform(next(keys), shape, jnp.float32, -bound, bound)

    def bidir_layer(in_dim, in_dim_pad):
        def one_dir():
            wih = uni((4 * H, in_dim))                 # PyTorch weight_ih_l*
            whh = uni((4 * H, H))                      # PyTorch weight_hh_l*
            b = uni((4 * H,)) + uni((4 * H,))          # bias_ih + bias_hh folded
            return wih, whh, b

        wih_f, whh_f, b_f = one_dir()
        wih_b, whh_b, b_b = one_dir()
        wih_t = jnp.concatenate([wih_f.T, wih_b.T], axis=1)            # (in_dim, 8H)
        wih_t = jnp.pad(wih_t, ((0, in_dim_pad - in_dim), (0, 0)))     # (in_dim_pad, 8H)
        whh_t = jnp.concatenate([whh_f.T, whh_b.T], axis=1)            # (H, 8H)
        b = jnp.concatenate([b_f, b_b])                                # (8H,)
        return wih_t, whh_t, b

    wih0, whh0, b0 = bidir_layer(input_dim, Dp)
    wih1, whh1, b1 = bidir_layer(2 * H, 2 * H)

    w1, bm1 = uni((H, 2 * H)), uni((H,))   # compress.0: Linear(2H -> H)
    w2, bm2 = uni((H, H)), uni((H,))       # compress.3: Linear(H -> H)

    w_slab = jnp.concatenate([wih0, whh0, wih1, whh1], axis=0).astype(jnp.bfloat16)  # (Dp+4H, 8H)
    head_slab = jnp.concatenate([w1.T, w2.T], axis=0).astype(jnp.bfloat16)           # (3H, H)
    bias_slab = jnp.zeros((4, 8 * H), jnp.float32)
    bias_slab = bias_slab.at[0].set(b0).at[1].set(b1)
    bias_slab = bias_slab.at[2, 0:H].set(bm1)
    bias_slab = bias_slab.at[3, 0:H].set(bm2)

    return {"w_slab": w_slab, "head_slab": head_slab, "bias_slab": bias_slab}


# ----------------------------------------------------------------------------
if __name__ == "__main__":
    B, T, D, H = 2, 8, 16, 32

    key = jax.random.PRNGKey(0)
    k_x, k_p = jax.random.split(key)
    x = jax.random.normal(k_x, (B, T, D), dtype=jnp.float32)
    params = init_params(k_p, D, H)

    fwd = jax.jit(lstm_compressor_forward)
    out = jax.block_until_ready(fwd(x, params))
    assert out.shape == (B, H), out.shape
    assert bool(jnp.all(jnp.isfinite(out)))
    print("KERNEL_OK")
</pallas_src>

<mosaic_0001>
module attributes {stable_mosaic.version = 11 : i64} {
  func.func @lstm_compressor_kernel(%arg0: memref<8x8x16xbf16, #tpu.memory_space<vmem>>, %arg1: memref<144x256xbf16, #tpu.memory_space<vmem>>, %arg2: memref<96x32xbf16, #tpu.memory_space<vmem>>, %arg3: memref<4x256xf32, #tpu.memory_space<vmem>>, %arg4: memref<8x32xf32, #tpu.memory_space<vmem>>) attributes {dimension_semantics = [], scalar_prefetch = 0 : i64, scratch_operands = 0 : i64, tpu.core_type = #tpu.core_type<tc>} {
    %c0 = arith.constant 0 : index
    %c0_0 = arith.constant 0 : index
    %0 = vector.load %arg1[%c0, %c0_0] : memref<144x256xbf16, #tpu.memory_space<vmem>>, vector<16x256xbf16>
    %c16 = arith.constant 16 : index
    %c0_1 = arith.constant 0 : index
    %1 = vector.load %arg1[%c16, %c0_1] : memref<144x256xbf16, #tpu.memory_space<vmem>>, vector<32x256xbf16>
    %c48 = arith.constant 48 : index
    %c0_2 = arith.constant 0 : index
    %2 = vector.load %arg1[%c48, %c0_2] : memref<144x256xbf16, #tpu.memory_space<vmem>>, vector<32x256xbf16>
    %c80 = arith.constant 80 : index
    %c0_3 = arith.constant 0 : index
    %3 = vector.load %arg1[%c80, %c0_3] : memref<144x256xbf16, #tpu.memory_space<vmem>>, vector<32x256xbf16>
    %c112 = arith.constant 112 : index
    %c0_4 = arith.constant 0 : index
    %4 = vector.load %arg1[%c112, %c0_4] : memref<144x256xbf16, #tpu.memory_space<vmem>>, vector<32x256xbf16>
    %c0_5 = arith.constant 0 : index
    %c0_6 = arith.constant 0 : index
    %5 = vector.load %arg3[%c0_5, %c0_6] : memref<4x256xf32, #tpu.memory_space<vmem>>, vector<1x256xf32>
    %c1 = arith.constant 1 : index
    %c0_7 = arith.constant 0 : index
    %6 = vector.load %arg3[%c1, %c0_7] : memref<4x256xf32, #tpu.memory_space<vmem>>, vector<1x256xf32>
    %c2 = arith.constant 2 : index
    %c0_8 = arith.constant 0 : index
    %7 = vector.load %arg3[%c2, %c0_8] : memref<4x256xf32, #tpu.memory_space<vmem>>, vector<1x32xf32>
    %c3 = arith.constant 3 : index
    %c0_9 = arith.constant 0 : index
    %8 = vector.load %arg3[%c3, %c0_9] : memref<4x256xf32, #tpu.memory_space<vmem>>, vector<1x32xf32>
    %c0_10 = arith.constant 0 : index
    %c0_11 = arith.constant 0 : index
    %c0_12 = arith.constant 0 : index
    %9 = vector.load %arg0[%c0_10, %c0_11, %c0_12] : memref<8x8x16xbf16, #tpu.memory_space<vmem>>, vector<8x8x16xbf16>
    %10 = vector.shape_cast %9 : vector<8x8x16xbf16> to vector<64x16xbf16>
    %cst = arith.constant dense<0.000000e+00> : vector<64x256xf32>
    %11 = tpu.matmul %10, %0, %cst {dimension_numbers = #tpu.dot_dimension_numbers<[1], [0], [0], [1], [0, 0, 1, 1], [], []>} : vector<64x16xbf16>, vector<16x256xbf16>, vector<64x256xf32> -> vector<64x256xf32>
    %12 = vector.broadcast %5 : vector<1x256xf32> to vector<64x256xf32>
    %13 = arith.addf %11, %12 : vector<64x256xf32>
    %14 = vector.shape_cast %13 : vector<64x256xf32> to vector<8x8x256xf32>
    %cst_13 = arith.constant 0.000000e+00 : bf16
    %15 = vector.broadcast %cst_13 : bf16 to vector<16x32xbf16>
    %cst_14 = arith.constant 0.000000e+00 : f32
    %16 = vector.broadcast %cst_14 : f32 to vector<16x32xf32>
    %cst_15 = arith.constant dense<0.000000e+00> : vector<16x256xf32>
    %17 = tpu.matmul %15, %1, %cst_15 {dimension_numbers = #tpu.dot_dimension_numbers<[1], [0], [0], [1], [0, 0, 1, 1], [], []>} : vector<16x32xbf16>, vector<32x256xbf16>, vector<16x256xf32> -> vector<16x256xf32>
    %18 = vector.extract_strided_slice %14 {offsets = [0, 0, 0], sizes = [1, 8, 256], strides = [1, 1, 1]} : vector<8x8x256xf32> to vector<1x8x256xf32>
    %19 = vector.shape_cast %18 : vector<1x8x256xf32> to vector<8x256xf32>
    %20 = vector.extract_strided_slice %19 {offsets = [0, 0], sizes = [8, 128], strides = [1, 1]} : vector<8x256xf32> to vector<8x128xf32>
    %21 = vector.extract_strided_slice %17 {offsets = [0, 0], sizes = [8, 128], strides = [1, 1]} : vector<16x256xf32> to vector<8x128xf32>
    %22 = arith.addf %20, %21 : vector<8x128xf32>
    %23 = vector.extract_strided_slice %14 {offsets = [7, 0, 0], sizes = [1, 8, 256], strides = [1, 1, 1]} : vector<8x8x256xf32> to vector<1x8x256xf32>
    %24 = vector.shape_cast %23 : vector<1x8x256xf32> to vector<8x256xf32>
    %25 = vector.extract_strided_slice %24 {offsets = [0, 128], sizes = [8, 128], strides = [1, 1]} : vector<8x256xf32> to vector<8x128xf32>
    %26 = vector.extract_strided_slice %17 {offsets = [8, 128], sizes = [8, 128], strides = [1, 1]} : vector<16x256xf32> to vector<8x128xf32>
    %27 = arith.addf %25, %26 : vector<8x128xf32>
    %28 = tpu.concatenate %22, %27 in 0 : vector<8x128xf32>, vector<8x128xf32> -> vector<16x128xf32>
    %29 = arith.negf %28 : vector<16x128xf32>
    %30 = math.exp %29 : vector<16x128xf32>
    %cst_16 = arith.constant 1.000000e+00 : f32
    %31 = vector.broadcast %cst_16 : f32 to vector<16x128xf32>
    %32 = arith.addf %31, %30 : vector<16x128xf32>
    %33 = arith.divf %31, %32 : vector<16x128xf32>
    %34 = vector.extract_strided_slice %28 {offsets = [0, 64], sizes = [16, 32], strides = [1, 1]} : vector<16x128xf32> to vector<16x32xf32>
    %35 = math.tanh %34 : vector<16x32xf32>
    %36 = vector.extract_strided_slice %33 {offsets = [0, 32], sizes = [16, 32], strides = [1, 1]} : vector<16x128xf32> to vector<16x32xf32>
    %37 = arith.mulf %36, %16 : vector<16x32xf32>
    %38 = vector.extract_strided_slice %33 {offsets = [0, 0], sizes = [16, 32], strides = [1, 1]} : vector<16x128xf32> to vector<16x32xf32>
    %39 = arith.mulf %38, %35 : vector<16x32xf32>
    %40 = arith.addf %37, %39 : vector<16x32xf32>
    %41 = vector.extract_strided_slice %33 {offsets = [0, 96], sizes = [16, 32], strides = [1, 1]} : vector<16x128xf32> to vector<16x32xf32>
    %42 = math.tanh %40 : vector<16x32xf32>
    %43 = arith.mulf %41, %42 : vector<16x32xf32>
    %44 = arith.truncf %43 : vector<16x32xf32> to vector<16x32xbf16>
    %45 = vector.extract_strided_slice %44 {offsets = [0, 0], sizes = [8, 32], strides = [1, 1]} : vector<16x32xbf16> to vector<8x32xbf16>
    %46 = vector.extract_strided_slice %44 {offsets = [8, 0], sizes = [8, 32], strides = [1, 1]} : vector<16x32xbf16> to vector<8x32xbf16>
    %cst_17 = arith.constant dense<0.000000e+00> : vector<16x256xf32>
    %47 = tpu.matmul %44, %1, %cst_17 {dimension_numbers = #tpu.dot_dimension_numbers<[1], [0], [0], [1], [0, 0, 1, 1], [], []>} : vector<16x32xbf16>, vector<32x256xbf16>, vector<16x256xf32> -> vector<16x256xf32>
    %48 = vector.extract_strided_slice %14 {offsets = [1, 0, 0], sizes = [1, 8, 256], strides = [1, 1, 1]} : vector<8x8x256xf32> to vector<1x8x256xf32>
    %49 = vector.shape_cast %48 : vector<1x8x256xf32> to vector<8x256xf32>
    %50 = vector.extract_strided_slice %49 {offsets = [0, 0], sizes = [8, 128], strides = [1, 1]} : vector<8x256xf32> to vector<8x128xf32>
    %51 = vector.extract_strided_slice %47 {offsets = [0, 0], sizes = [8, 128], strides = [1, 1]} : vector<16x256xf32> to vector<8x128xf32>
    %52 = arith.addf %50, %51 : vector<8x128xf32>
    %53 = vector.extract_strided_slice %14 {offsets = [6, 0, 0], sizes = [1, 8, 256], strides = [1, 1, 1]} : vector<8x8x256xf32> to vector<1x8x256xf32>
    %54 = vector.shape_cast %53 : vector<1x8x256xf32> to vector<8x256xf32>
    %55 = vector.extract_strided_slice %54 {offsets = [0, 128], sizes = [8, 128], strides = [1, 1]} : vector<8x256xf32> to vector<8x128xf32>
    %56 = vector.extract_strided_slice %47 {offsets = [8, 128], sizes = [8, 128], strides = [1, 1]} : vector<16x256xf32> to vector<8x128xf32>
    %57 = arith.addf %55, %56 : vector<8x128xf32>
    %58 = tpu.concatenate %52, %57 in 0 : vector<8x128xf32>, vector<8x128xf32> -> vector<16x128xf32>
    %59 = arith.negf %58 : vector<16x128xf32>
    %60 = math.exp %59 : vector<16x128xf32>
    %cst_18 = arith.constant 1.000000e+00 : f32
    %61 = vector.broadcast %cst_18 : f32 to vector<16x128xf32>
    %62 = arith.addf %61, %60 : vector<16x128xf32>
    %63 = arith.divf %61, %62 : vector<16x128xf32>
    %64 = vector.extract_strided_slice %58 {offsets = [0, 64], sizes = [16, 32], strides = [1, 1]} : vector<16x128xf32> to vector<16x32xf32>
    %65 = math.tanh %64 : vector<16x32xf32>
    %66 = vector.extract_strided_slice %63 {offsets = [0, 32], sizes = [16, 32], strides = [1, 1]} : vector<16x128xf32> to vector<16x32xf32>
    %67 = arith.mulf %66, %40 : vector<16x32xf32>
    %68 = vector.extract_strided_slice %63 {offsets = [0, 0], sizes = [16, 32], strides = [1, 1]} : vector<16x128xf32> to vector<16x32xf32>
    %69 = arith.mulf %68, %65 : vector<16x32xf32>
    %70 = arith.addf %67, %69 : vector<16x32xf32>
    %71 = vector.extract_strided_slice %63 {offsets = [0, 96], sizes = [16, 32], strides = [1, 1]} : vector<16x128xf32> to vector<16x32xf32>
    %72 = math.tanh %70 : vector<16x32xf32>
    %73 = arith.mulf %71, %72 : vector<16x32xf32>
    %74 = arith.truncf %73 : vector<16x32xf32> to vector<16x32xbf16>
    %75 = vector.extract_strided_slice %74 {offsets = [0, 0], sizes = [8, 32], strides = [1, 1]} : vector<16x32xbf16> to vector<8x32xbf16>
    %76 = vector.extract_strided_slice %74 {offsets = [8, 0], sizes = [8, 32], strides = [1, 1]} : vector<16x32xbf16> to vector<8x32xbf16>
    %cst_19 = arith.constant dense<0.000000e+00> : vector<16x256xf32>
    %77 = tpu.matmul %74, %1, %cst_19 {dimension_numbers = #tpu.dot_dimension_numbers<[1], [0], [0], [1], [0, 0, 1, 1], [], []>} : vector<16x32xbf16>, vector<32x256xbf16>, vector<16x256xf32> -> vector<16x256xf32>
    %78 = vector.extract_strided_slice %14 {offsets = [2, 0, 0], sizes = [1, 8, 256], strides = [1, 1, 1]} : vector<8x8x256xf32> to vector<1x8x256xf32>
    %79 = vector.shape_cast %78 : vector<1x8x256xf32> to vector<8x256xf32>
    %80 = vector.extract_strided_slice %79 {offsets = [0, 0], sizes = [8, 128], strides = [1, 1]} : vector<8x256xf32> to vector<8x128xf32>
    %81 = vector.extract_strided_slice %77 {offsets = [0, 0], sizes = [8, 128], strides = [1, 1]} : vector<16x256xf32> to vector<8x128xf32>
    %82 = arith.addf %80, %81 : vector<8x128xf32>
    %83 = vector.extract_strided_slice %14 {offsets = [5, 0, 0], sizes = [1, 8, 256], strides = [1, 1, 1]} : vector<8x8x256xf32> to vector<1x8x256xf32>
    %84 = vector.shape_cast %83 : vector<1x8x256xf32> to vector<8x256xf32>
    %85 = vector.extract_strided_slice %84 {offsets = [0, 128], sizes = [8, 128], strides = [1, 1]} : vector<8x256xf32> to vector<8x128xf32>
    %86 = vector.extract_strided_slice %77 {offsets = [8, 128], sizes = [8, 128], strides = [1, 1]} : vector<16x256xf32> to vector<8x128xf32>
    %87 = arith.addf %85, %86 : vector<8x128xf32>
    %88 = tpu.concatenate %82, %87 in 0 : vector<8x128xf32>, vector<8x128xf32> -> vector<16x128xf32>
    %89 = arith.negf %88 : vector<16x128xf32>
    %90 = math.exp %89 : vector<16x128xf32>
    %cst_20 = arith.constant 1.000000e+00 : f32
    %91 = vector.broadcast %cst_20 : f32 to vector<16x128xf32>
    %92 = arith.addf %91, %90 : vector<16x128xf32>
    %93 = arith.divf %91, %92 : vector<16x128xf32>
    %94 = vector.extract_strided_slice %88 {offsets = [0, 64], sizes = [16, 32], strides = [1, 1]} : vector<16x128xf32> to vector<16x32xf32>
    %95 = math.tanh %94 : vector<16x32xf32>
    %96 = vector.extract_strided_slice %93 {offsets = [0, 32], sizes = [16, 32], strides = [1, 1]} : vector<16x128xf32> to vector<16x32xf32>
    %97 = arith.mulf %96, %70 : vector<16x32xf32>
    %98 = vector.extract_strided_slice %93 {offsets = [0, 0], sizes = [16, 32], strides = [1, 1]} : vector<16x128xf32> to vector<16x32xf32>
    %99 = arith.mulf %98, %95 : vector<16x32xf32>
    %100 = arith.addf %97, %99 : vector<16x32xf32>
    %101 = vector.extract_strided_slice %93 {offsets = [0, 96], sizes = [16, 32], strides = [1, 1]} : vector<16x128xf32> to vector<16x32xf32>
    %102 = math.tanh %100 : vector<16x32xf32>
    %103 = arith.mulf %101, %102 : vector<16x32xf32>
    %104 = arith.truncf %103 : vector<16x32xf32> to vector<16x32xbf16>
    %105 = vector.extract_strided_slice %104 {offsets = [0, 0], sizes = [8, 32], strides = [1, 1]} : vector<16x32xbf16> to vector<8x32xbf16>
    %106 = vector.extract_strided_slice %104 {offsets = [8, 0], sizes = [8, 32], strides = [1, 1]} : vector<16x32xbf16> to vector<8x32xbf16>
    %cst_21 = arith.constant dense<0.000000e+00> : vector<16x256xf32>
    %107 = tpu.matmul %104, %1, %cst_21 {dimension_numbers = #tpu.dot_dimension_numbers<[1], [0], [0], [1], [0, 0, 1, 1], [], []>} : vector<16x32xbf16>, vector<32x256xbf16>, vector<16x256xf32> -> vector<16x256xf32>
    %108 = vector.extract_strided_slice %14 {offsets = [3, 0, 0], sizes = [1, 8, 256], strides = [1, 1, 1]} : vector<8x8x256xf32> to vector<1x8x256xf32>
    %109 = vector.shape_cast %108 : vector<1x8x256xf32> to vector<8x256xf32>
    %110 = vector.extract_strided_slice %109 {offsets = [0, 0], sizes = [8, 128], strides = [1, 1]} : vector<8x256xf32> to vector<8x128xf32>
    %111 = vector.extract_strided_slice %107 {offsets = [0, 0], sizes = [8, 128], strides = [1, 1]} : vector<16x256xf32> to vector<8x128xf32>
    %112 = arith.addf %110, %111 : vector<8x128xf32>
    %113 = vector.extract_strided_slice %14 {offsets = [4, 0, 0], sizes = [1, 8, 256], strides = [1, 1, 1]} : vector<8x8x256xf32> to vector<1x8x256xf32>
    %114 = vector.shape_cast %113 : vector<1x8x256xf32> to vector<8x256xf32>
    %115 = vector.extract_strided_slice %114 {offsets = [0, 128], sizes = [8, 128], strides = [1, 1]} : vector<8x256xf32> to vector<8x128xf32>
    %116 = vector.extract_strided_slice %107 {offsets = [8, 128], sizes = [8, 128], strides = [1, 1]} : vector<16x256xf32> to vector<8x128xf32>
    %117 = arith.addf %115, %116 : vector<8x128xf32>
    %118 = tpu.concatenate %112, %117 in 0 : vector<8x128xf32>, vector<8x128xf32> -> vector<16x128xf32>
    %119 = arith.negf %118 : vector<16x128xf32>
    %120 = math.exp %119 : vector<16x128xf32>
    %cst_22 = arith.constant 1.000000e+00 : f32
    %121 = vector.broadcast %cst_22 : f32 to vector<16x128xf32>
    %122 = arith.addf %121, %120 : vector<16x128xf32>
    %123 = arith.divf %121, %122 : vector<16x128xf32>
    %124 = vector.extract_strided_slice %118 {offsets = [0, 64], sizes = [16, 32], strides = [1, 1]} : vector<16x128xf32> to vector<16x32xf32>
    %125 = math.tanh %124 : vector<16x32xf32>
    %126 = vector.extract_strided_slice %123 {offsets = [0, 32], sizes = [16, 32], strides = [1, 1]} : vector<16x128xf32> to vector<16x32xf32>
    %127 = arith.mulf %126, %100 : vector<16x32xf32>
    %128 = vector.extract_strided_slice %123 {offsets = [0, 0], sizes = [16, 32], strides = [1, 1]} : vector<16x128xf32> to vector<16x32xf32>
    %129 = arith.mulf %128, %125 : vector<16x32xf32>
    %130 = arith.addf %127, %129 : vector<16x32xf32>
    %131 = vector.extract_strided_slice %123 {offsets = [0, 96], sizes = [16, 32], strides = [1, 1]} : vector<16x128xf32> to vector<16x32xf32>
    %132 = math.tanh %130 : vector<16x32xf32>
    %133 = arith.mulf %131, %132 : vector<16x32xf32>
    %134 = arith.truncf %133 : vector<16x32xf32> to vector<16x32xbf16>
    %135 = vector.extract_strided_slice %134 {offsets = [0, 0], sizes = [8, 32], strides = [1, 1]} : vector<16x32xbf16> to vector<8x32xbf16>
    %136 = vector.extract_strided_slice %134 {offsets = [8, 0], sizes = [8, 32], strides = [1, 1]} : vector<16x32xbf16> to vector<8x32xbf16>
    %cst_23 = arith.constant dense<0.000000e+00> : vector<16x256xf32>
    %137 = tpu.matmul %134, %1, %cst_23 {dimension_numbers = #tpu.dot_dimension_numbers<[1], [0], [0], [1], [0, 0, 1, 1], [], []>} : vector<16x32xbf16>, vector<32x256xbf16>, vector<16x256xf32> -> vector<16x256xf32>
    %138 = vector.extract_strided_slice %14 {offsets = [4, 0, 0], sizes = [1, 8, 256], strides = [1, 1, 1]} : vector<8x8x256xf32> to vector<1x8x256xf32>
    %139 = vector.shape_cast %138 : vector<1x8x256xf32> to vector<8x256xf32>
    %140 = vector.extract_strided_slice %139 {offsets = [0, 0], sizes = [8, 128], strides = [1, 1]} : vector<8x256xf32> to vector<8x128xf32>
    %141 = vector.extract_strided_slice %137 {offsets = [0, 0], sizes = [8, 128], strides = [1, 1]} : vector<16x256xf32> to vector<8x128xf32>
    %142 = arith.addf %140, %141 : vector<8x128xf32>
    %143 = vector.extract_strided_slice %14 {offsets = [3, 0, 0], sizes = [1, 8, 256], strides = [1, 1, 1]} : vector<8x8x256xf32> to vector<1x8x256xf32>
    %144 = vector.shape_cast %143 : vector<1x8x256xf32> to vector<8x256xf32>
    %145 = vector.extract_strided_slice %144 {offsets = [0, 128], sizes = [8, 128], strides = [1, 1]} : vector<8x256xf32> to vector<8x128xf32>
    %146 = vector.extract_strided_slice %137 {offsets = [8, 128], sizes = [8, 128], strides = [1, 1]} : vector<16x256xf32> to vector<8x128xf32>
    %147 = arith.addf %145, %146 : vector<8x128xf32>
    %148 = tpu.concatenate %142, %147 in 0 : vector<8x128xf32>, vector<8x128xf32> -> vector<16x128xf32>
    %149 = arith.negf %148 : vector<16x128xf32>
    %150 = math.exp %149 : vector<16x128xf32>
    %cst_24 = arith.constant 1.000000e+00 : f32
    %151 = vector.broadcast %cst_24 : f32 to vector<16x128xf32>
    %152 = arith.addf %151, %150 : vector<16x128xf32>
    %153 = arith.divf %151, %152 : vector<16x128xf32>
    %154 = vector.extract_strided_slice %148 {offsets = [0, 64], sizes = [16, 32], strides = [1, 1]} : vector<16x128xf32> to vector<16x32xf32>
    %155 = math.tanh %154 : vector<16x32xf32>
    %156 = vector.extract_strided_slice %153 {offsets = [0, 32], sizes = [16, 32], strides = [1, 1]} : vector<16x128xf32> to vector<16x32xf32>
    %157 = arith.mulf %156, %130 : vector<16x32xf32>
    %158 = vector.extract_strided_slice %153 {offsets = [0, 0], sizes = [16, 32], strides = [1, 1]} : vector<16x128xf32> to vector<16x32xf32>
    %159 = arith.mulf %158, %155 : vector<16x32xf32>
    %160 = arith.addf %157, %159 : vector<16x32xf32>
    %161 = vector.extract_strided_slice %153 {offsets = [0, 96], sizes = [16, 32], strides = [1, 1]} : vector<16x128xf32> to vector<16x32xf32>
    %162 = math.tanh %160 : vector<16x32xf32>
    %163 = arith.mulf %161, %162 : vector<16x32xf32>
    %164 = arith.truncf %163 : vector<16x32xf32> to vector<16x32xbf16>
    %165 = vector.extract_strided_slice %164 {offsets = [0, 0], sizes = [8, 32], strides = [1, 1]} : vector<16x32xbf16> to vector<8x32xbf16>
    %166 = vector.extract_strided_slice %164 {offsets = [8, 0], sizes = [8, 32], strides = [1, 1]} : vector<16x32xbf16> to vector<8x32xbf16>
    %cst_25 = arith.constant dense<0.000000e+00> : vector<16x256xf32>
    %167 = tpu.matmul %164, %1, %cst_25 {dimension_numbers = #tpu.dot_dimension_numbers<[1], [0], [0], [1], [0, 0, 1, 1], [], []>} : vector<16x32xbf16>, vector<32x256xbf16>, vector<16x256xf32> -> vector<16x256xf32>
    %168 = vector.extract_strided_slice %14 {offsets = [5, 0, 0], sizes = [1, 8, 256], strides = [1, 1, 1]} : vector<8x8x256xf32> to vector<1x8x256xf32>
    %169 = vector.shape_cast %168 : vector<1x8x256xf32> to vector<8x256xf32>
    %170 = vector.extract_strided_slice %169 {offsets = [0, 0], sizes = [8, 128], strides = [1, 1]} : vector<8x256xf32> to vector<8x128xf32>
    %171 = vector.extract_strided_slice %167 {offsets = [0, 0], sizes = [8, 128], strides = [1, 1]} : vector<16x256xf32> to vector<8x128xf32>
    %172 = arith.addf %170, %171 : vector<8x128xf32>
    %173 = vector.extract_strided_slice %14 {offsets = [2, 0, 0], sizes = [1, 8, 256], strides = [1, 1, 1]} : vector<8x8x256xf32> to vector<1x8x256xf32>
    %174 = vector.shape_cast %173 : vector<1x8x256xf32> to vector<8x256xf32>
    %175 = vector.extract_strided_slice %174 {offsets = [0, 128], sizes = [8, 128], strides = [1, 1]} : vector<8x256xf32> to vector<8x128xf32>
    %176 = vector.extract_strided_slice %167 {offsets = [8, 128], sizes = [8, 128], strides = [1, 1]} : vector<16x256xf32> to vector<8x128xf32>
    %177 = arith.addf %175, %176 : vector<8x128xf32>
    %178 = tpu.concatenate %172, %177 in 0 : vector<8x128xf32>, vector<8x128xf32> -> vector<16x128xf32>
    %179 = arith.negf %178 : vector<16x128xf32>
    %180 = math.exp %179 : vector<16x128xf32>
    %cst_26 = arith.constant 1.000000e+00 : f32
    %181 = vector.broadcast %cst_26 : f32 to vector<16x128xf32>
    %182 = arith.addf %181, %180 : vector<16x128xf32>
    %183 = arith.divf %181, %182 : vector<16x128xf32>
    %184 = vector.extract_strided_slice %178 {offsets = [0, 64], sizes = [16, 32], strides = [1, 1]} : vector<16x128xf32> to vector<16x32xf32>
    %185 = math.tanh %184 : vector<16x32xf32>
    %186 = vector.extract_strided_slice %183 {offsets = [0, 32], sizes = [16, 32], strides = [1, 1]} : vector<16x128xf32> to vector<16x32xf32>
    %187 = arith.mulf %186, %160 : vector<16x32xf32>
    %188 = vector.extract_strided_slice %183 {offsets = [0, 0], sizes = [16, 32], strides = [1, 1]} : vector<16x128xf32> to vector<16x32xf32>
    %189 = arith.mulf %188, %185 : vector<16x32xf32>
    %190 = arith.addf %187, %189 : vector<16x32xf32>
    %191 = vector.extract_strided_slice %183 {offsets = [0, 96], sizes = [16, 32], strides = [1, 1]} : vector<16x128xf32> to vector<16x32xf32>
    %192 = math.tanh %190 : vector<16x32xf32>
    %193 = arith.mulf %191, %192 : vector<16x32xf32>
    %194 = arith.truncf %193 : vector<16x32xf32> to vector<16x32xbf16>
    %195 = vector.extract_strided_slice %194 {offsets = [0, 0], sizes = [8, 32], strides = [1, 1]} : vector<16x32xbf16> to vector<8x32xbf16>
    %196 = vector.extract_strided_slice %194 {offsets = [8, 0], sizes = [8, 32], strides = [1, 1]} : vector<16x32xbf16> to vector<8x32xbf16>
    %cst_27 = arith.constant dense<0.000000e+00> : vector<16x256xf32>
    %197 = tpu.matmul %194, %1, %cst_27 {dimension_numbers = #tpu.dot_dimension_numbers<[1], [0], [0], [1], [0, 0, 1, 1], [], []>} : vector<16x32xbf16>, vector<32x256xbf16>, vector<16x256xf32> -> vector<16x256xf32>
    %198 = vector.extract_strided_slice %14 {offsets = [6, 0, 0], sizes = [1, 8, 256], strides = [1, 1, 1]} : vector<8x8x256xf32> to vector<1x8x256xf32>
    %199 = vector.shape_cast %198 : vector<1x8x256xf32> to vector<8x256xf32>
    %200 = vector.extract_strided_slice %199 {offsets = [0, 0], sizes = [8, 128], strides = [1, 1]} : vector<8x256xf32> to vector<8x128xf32>
    %201 = vector.extract_strided_slice %197 {offsets = [0, 0], sizes = [8, 128], strides = [1, 1]} : vector<16x256xf32> to vector<8x128xf32>
    %202 = arith.addf %200, %201 : vector<8x128xf32>
    %203 = vector.extract_strided_slice %14 {offsets = [1, 0, 0], sizes = [1, 8, 256], strides = [1, 1, 1]} : vector<8x8x256xf32> to vector<1x8x256xf32>
    %204 = vector.shape_cast %203 : vector<1x8x256xf32> to vector<8x256xf32>
    %205 = vector.extract_strided_slice %204 {offsets = [0, 128], sizes = [8, 128], strides = [1, 1]} : vector<8x256xf32> to vector<8x128xf32>
    %206 = vector.extract_strided_slice %197 {offsets = [8, 128], sizes = [8, 128], strides = [1, 1]} : vector<16x256xf32> to vector<8x128xf32>
    %207 = arith.addf %205, %206 : vector<8x128xf32>
    %208 = tpu.concatenate %202, %207 in 0 : vector<8x128xf32>, vector<8x128xf32> -> vector<16x128xf32>
    %209 = arith.negf %208 : vector<16x128xf32>
    %210 = math.exp %209 : vector<16x128xf32>
    %cst_28 = arith.constant 1.000000e+00 : f32
    %211 = vector.broadcast %cst_28 : f32 to vector<16x128xf32>
    %212 = arith.addf %211, %210 : vector<16x128xf32>
    %213 = arith.divf %211, %212 : vector<16x128xf32>
    %214 = vector.extract_strided_slice %208 {offsets = [0, 64], sizes = [16, 32], strides = [1, 1]} : vector<16x128xf32> to vector<16x32xf32>
    %215 = math.tanh %214 : vector<16x32xf32>
    %216 = vector.extract_strided_slice %213 {offsets = [0, 32], sizes = [16, 32], strides = [1, 1]} : vector<16x128xf32> to vector<16x32xf32>
    %217 = arith.mulf %216, %190 : vector<16x32xf32>
    %218 = vector.extract_strided_slice %213 {offsets = [0, 0], sizes = [16, 32], strides = [1, 1]} : vector<16x128xf32> to vector<16x32xf32>
    %219 = arith.mulf %218, %215 : vector<16x32xf32>
    %220 = arith.addf %217, %219 : vector<16x32xf32>
    %221 = vector.extract_strided_slice %213 {offsets = [0, 96], sizes = [16, 32], strides = [1, 1]} : vector<16x128xf32> to vector<16x32xf32>
    %222 = math.tanh %220 : vector<16x32xf32>
    %223 = arith.mulf %221, %222 : vector<16x32xf32>
    %224 = arith.truncf %223 : vector<16x32xf32> to vector<16x32xbf16>
    %225 = vector.extract_strided_slice %224 {offsets = [0, 0], sizes = [8, 32], strides = [1, 1]} : vector<16x32xbf16> to vector<8x32xbf16>
    %226 = vector.extract_strided_slice %224 {offsets = [8, 0], sizes = [8, 32], strides = [1, 1]} : vector<16x32xbf16> to vector<8x32xbf16>
    %cst_29 = arith.constant dense<0.000000e+00> : vector<16x256xf32>
    %227 = tpu.matmul %224, %1, %cst_29 {dimension_numbers = #tpu.dot_dimension_numbers<[1], [0], [0], [1], [0, 0, 1, 1], [], []>} : vector<16x32xbf16>, vector<32x256xbf16>, vector<16x256xf32> -> vector<16x256xf32>
    %228 = vector.extract_strided_slice %14 {offsets = [7, 0, 0], sizes = [1, 8, 256], strides = [1, 1, 1]} : vector<8x8x256xf32> to vector<1x8x256xf32>
    %229 = vector.shape_cast %228 : vector<1x8x256xf32> to vector<8x256xf32>
    %230 = vector.extract_strided_slice %229 {offsets = [0, 0], sizes = [8, 128], strides = [1, 1]} : vector<8x256xf32> to vector<8x128xf32>
    %231 = vector.extract_strided_slice %227 {offsets = [0, 0], sizes = [8, 128], strides = [1, 1]} : vector<16x256xf32> to vector<8x128xf32>
    %232 = arith.addf %230, %231 : vector<8x128xf32>
    %233 = vector.extract_strided_slice %14 {offsets = [0, 0, 0], sizes = [1, 8, 256], strides = [1, 1, 1]} : vector<8x8x256xf32> to vector<1x8x256xf32>
    %234 = vector.shape_cast %233 : vector<1x8x256xf32> to vector<8x256xf32>
    %235 = vector.extract_strided_slice %234 {offsets = [0, 128], sizes = [8, 128], strides = [1, 1]} : vector<8x256xf32> to vector<8x128xf32>
    %236 = vector.extract_strided_slice %227 {offsets = [8, 128], sizes = [8, 128], strides = [1, 1]} : vector<16x256xf32> to vector<8x128xf32>
    %237 = arith.addf %235, %236 : vector<8x128xf32>
    %238 = tpu.concatenate %232, %237 in 0 : vector<8x128xf32>, vector<8x128xf32> -> vector<16x128xf32>
    %239 = arith.negf %238 : vector<16x128xf32>
    %240 = math.exp %239 : vector<16x128xf32>
    %cst_30 = arith.constant 1.000000e+00 : f32
    %241 = vector.broadcast %cst_30 : f32 to vector<16x128xf32>
    %242 = arith.addf %241, %240 : vector<16x128xf32>
    %243 = arith.divf %241, %242 : vector<16x128xf32>
    %244 = vector.extract_strided_slice %238 {offsets = [0, 64], sizes = [16, 32], strides = [1, 1]} : vector<16x128xf32> to vector<16x32xf32>
    %245 = math.tanh %244 : vector<16x32xf32>
    %246 = vector.extract_strided_slice %243 {offsets = [0, 32], sizes = [16, 32], strides = [1, 1]} : vector<16x128xf32> to vector<16x32xf32>
    %247 = arith.mulf %246, %220 : vector<16x32xf32>
    %248 = vector.extract_strided_slice %243 {offsets = [0, 0], sizes = [16, 32], strides = [1, 1]} : vector<16x128xf32> to vector<16x32xf32>
    %249 = arith.mulf %248, %245 : vector<16x32xf32>
    %250 = arith.addf %247, %249 : vector<16x32xf32>
    %251 = vector.extract_strided_slice %243 {offsets = [0, 96], sizes = [16, 32], strides = [1, 1]} : vector<16x128xf32> to vector<16x32xf32>
    %252 = math.tanh %250 : vector<16x32xf32>
    %253 = arith.mulf %251, %252 : vector<16x32xf32>
    %254 = arith.truncf %253 : vector<16x32xf32> to vector<16x32xbf16>
    %255 = vector.extract_strided_slice %254 {offsets = [0, 0], sizes = [8, 32], strides = [1, 1]} : vector<16x32xbf16> to vector<8x32xbf16>
    %256 = vector.extract_strided_slice %254 {offsets = [8, 0], sizes = [8, 32], strides = [1, 1]} : vector<16x32xbf16> to vector<8x32xbf16>
    %257 = tpu.concatenate %45, %75, %105, %135, %165, %195, %225, %255 in 0 : vector<8x32xbf16>, vector<8x32xbf16>, vector<8x32xbf16>, vector<8x32xbf16>, vector<8x32xbf16>, vector<8x32xbf16>, vector<8x32xbf16>, vector<8x32xbf16> -> vector<64x32xbf16>
    %258 = tpu.concatenate %256, %226, %196, %166, %136, %106, %76, %46 in 0 : vector<8x32xbf16>, vector<8x32xbf16>, vector<8x32xbf16>, vector<8x32xbf16>, vector<8x32xbf16>, vector<8x32xbf16>, vector<8x32xbf16>, vector<8x32xbf16> -> vector<64x32xbf16>
    %cst_31 = arith.constant dense<0.000000e+00> : vector<64x256xf32>
    %259 = tpu.matmul %257, %2, %cst_31 {dimension_numbers = #tpu.dot_dimension_numbers<[1], [0], [0], [1], [0, 0, 1, 1], [], []>} : vector<64x32xbf16>, vector<32x256xbf16>, vector<64x256xf32> -> vector<64x256xf32>
    %cst_32 = arith.constant dense<0.000000e+00> : vector<64x256xf32>
    %260 = tpu.matmul %258, %3, %cst_32 {dimension_numbers = #tpu.dot_dimension_numbers<[1], [0], [0], [1], [0, 0, 1, 1], [], []>} : vector<64x32xbf16>, vector<32x256xbf16>, vector<64x256xf32> -> vector<64x256xf32>
    %261 = arith.addf %259, %260 : vector<64x256xf32>
    %262 = vector.broadcast %6 : vector<1x256xf32> to vector<64x256xf32>
    %263 = arith.addf %261, %262 : vector<64x256xf32>
    %264 = vector.shape_cast %263 : vector<64x256xf32> to vector<8x8x256xf32>
    %cst_33 = arith.constant 0.000000e+00 : bf16
    %265 = vector.broadcast %cst_33 : bf16 to vector<16x32xbf16>
    %cst_34 = arith.constant 0.000000e+00 : f32
    %266 = vector.broadcast %cst_34 : f32 to vector<16x32xf32>
    %cst_35 = arith.constant dense<0.000000e+00> : vector<16x256xf32>
    %267 = tpu.matmul %265, %4, %cst_35 {dimension_numbers = #tpu.dot_dimension_numbers<[1], [0], [0], [1], [0, 0, 1, 1], [], []>} : vector<16x32xbf16>, vector<32x256xbf16>, vector<16x256xf32> -> vector<16x256xf32>
    %268 = vector.extract_strided_slice %264 {offsets = [0, 0, 0], sizes = [1, 8, 256], strides = [1, 1, 1]} : vector<8x8x256xf32> to vector<1x8x256xf32>
    %269 = vector.shape_cast %268 : vector<1x8x256xf32> to vector<8x256xf32>
    %270 = vector.extract_strided_slice %269 {offsets = [0, 0], sizes = [8, 128], strides = [1, 1]} : vector<8x256xf32> to vector<8x128xf32>
    %271 = vector.extract_strided_slice %267 {offsets = [0, 0], sizes = [8, 128], strides = [1, 1]} : vector<16x256xf32> to vector<8x128xf32>
    %272 = arith.addf %270, %271 : vector<8x128xf32>
    %273 = vector.extract_strided_slice %264 {offsets = [7, 0, 0], sizes = [1, 8, 256], strides = [1, 1, 1]} : vector<8x8x256xf32> to vector<1x8x256xf32>
    %274 = vector.shape_cast %273 : vector<1x8x256xf32> to vector<8x256xf32>
    %275 = vector.extract_strided_slice %274 {offsets = [0, 128], sizes = [8, 128], strides = [1, 1]} : vector<8x256xf32> to vector<8x128xf32>
    %276 = vector.extract_strided_slice %267 {offsets = [8, 128], sizes = [8, 128], strides = [1, 1]} : vector<16x256xf32> to vector<8x128xf32>
    %277 = arith.addf %275, %276 : vector<8x128xf32>
    %278 = tpu.concatenate %272, %277 in 0 : vector<8x128xf32>, vector<8x128xf32> -> vector<16x128xf32>
    %279 = arith.negf %278 : vector<16x128xf32>
    %280 = math.exp %279 : vector<16x128xf32>
    %cst_36 = arith.constant 1.000000e+00 : f32
    %281 = vector.broadcast %cst_36 : f32 to vector<16x128xf32>
    %282 = arith.addf %281, %280 : vector<16x128xf32>
    %283 = arith.divf %281, %282 : vector<16x128xf32>
    %284 = vector.extract_strided_slice %278 {offsets = [0, 64], sizes = [16, 32], strides = [1, 1]} : vector<16x128xf32> to vector<16x32xf32>
    %285 = math.tanh %284 : vector<16x32xf32>
    %286 = vector.extract_strided_slice %283 {offsets = [0, 32], sizes = [16, 32], strides = [1, 1]} : vector<16x128xf32> to vector<16x32xf32>
    %287 = arith.mulf %286, %266 : vector<16x32xf32>
    %288 = vector.extract_strided_slice %283 {offsets = [0, 0], sizes = [16, 32], strides = [1, 1]} : vector<16x128xf32> to vector<16x32xf32>
    %289 = arith.mulf %288, %285 : vector<16x32xf32>
    %290 = arith.addf %287, %289 : vector<16x32xf32>
    %291 = vector.extract_strided_slice %283 {offsets = [0, 96], sizes = [16, 32], strides = [1, 1]} : vector<16x128xf32> to vector<16x32xf32>
    %292 = math.tanh %290 : vector<16x32xf32>
    %293 = arith.mulf %291, %292 : vector<16x32xf32>
    %294 = arith.truncf %293 : vector<16x32xf32> to vector<16x32xbf16>
    %cst_37 = arith.constant dense<0.000000e+00> : vector<16x256xf32>
    %295 = tpu.matmul %294, %4, %cst_37 {dimension_numbers = #tpu.dot_dimension_numbers<[1], [0], [0], [1], [0, 0, 1, 1], [], []>} : vector<16x32xbf16>, vector<32x256xbf16>, vector<16x256xf32> -> vector<16x256xf32>
    %296 = vector.extract_strided_slice %264 {offsets = [1, 0, 0], sizes = [1, 8, 256], strides = [1, 1, 1]} : vector<8x8x256xf32> to vector<1x8x256xf32>
    %297 = vector.shape_cast %296 : vector<1x8x256xf32> to vector<8x256xf32>
    %298 = vector.extract_strided_slice %297 {offsets = [0, 0], sizes = [8, 128], strides = [1, 1]} : vector<8x256xf32> to vector<8x128xf32>
    %299 = vector.extract_strided_slice %295 {offsets = [0, 0], sizes = [8, 128], strides = [1, 1]} : vector<16x256xf32> to vector<8x128xf32>
    %300 = arith.addf %298, %299 : vector<8x128xf32>
    %301 = vector.extract_strided_slice %264 {offsets = [6, 0, 0], sizes = [1, 8, 256], strides = [1, 1, 1]} : vector<8x8x256xf32> to vector<1x8x256xf32>
    %302 = vector.shape_cast %301 : vector<1x8x256xf32> to vector<8x256xf32>
    %303 = vector.extract_strided_slice %302 {offsets = [0, 128], sizes = [8, 128], strides = [1, 1]} : vector<8x256xf32> to vector<8x128xf32>
    %304 = vector.extract_strided_slice %295 {offsets = [8, 128], sizes = [8, 128], strides = [1, 1]} : vector<16x256xf32> to vector<8x128xf32>
    %305 = arith.addf %303, %304 : vector<8x128xf32>
    %306 = tpu.concatenate %300, %305 in 0 : vector<8x128xf32>, vector<8x128xf32> -> vector<16x128xf32>
    %307 = arith.negf %306 : vector<16x128xf32>
    %308 = math.exp %307 : vector<16x128xf32>
    %cst_38 = arith.constant 1.000000e+00 : f32
    %309 = vector.broadcast %cst_38 : f32 to vector<16x128xf32>
    %310 = arith.addf %309, %308 : vector<16x128xf32>
    %311 = arith.divf %309, %310 : vector<16x128xf32>
    %312 = vector.extract_strided_slice %306 {offsets = [0, 64], sizes = [16, 32], strides = [1, 1]} : vector<16x128xf32> to vector<16x32xf32>
    %313 = math.tanh %312 : vector<16x32xf32>
    %314 = vector.extract_strided_slice %311 {offsets = [0, 32], sizes = [16, 32], strides = [1, 1]} : vector<16x128xf32> to vector<16x32xf32>
    %315 = arith.mulf %314, %290 : vector<16x32xf32>
    %316 = vector.extract_strided_slice %311 {offsets = [0, 0], sizes = [16, 32], strides = [1, 1]} : vector<16x128xf32> to vector<16x32xf32>
    %317 = arith.mulf %316, %313 : vector<16x32xf32>
    %318 = arith.addf %315, %317 : vector<16x32xf32>
    %319 = vector.extract_strided_slice %311 {offsets = [0, 96], sizes = [16, 32], strides = [1, 1]} : vector<16x128xf32> to vector<16x32xf32>
    %320 = math.tanh %318 : vector<16x32xf32>
    %321 = arith.mulf %319, %320 : vector<16x32xf32>
    %322 = arith.truncf %321 : vector<16x32xf32> to vector<16x32xbf16>
    %cst_39 = arith.constant dense<0.000000e+00> : vector<16x256xf32>
    %323 = tpu.matmul %322, %4, %cst_39 {dimension_numbers = #tpu.dot_dimension_numbers<[1], [0], [0], [1], [0, 0, 1, 1], [], []>} : vector<16x32xbf16>, vector<32x256xbf16>, vector<16x256xf32> -> vector<16x256xf32>
    %324 = vector.extract_strided_slice %264 {offsets = [2, 0, 0], sizes = [1, 8, 256], strides = [1, 1, 1]} : vector<8x8x256xf32> to vector<1x8x256xf32>
    %325 = vector.shape_cast %324 : vector<1x8x256xf32> to vector<8x256xf32>
    %326 = vector.extract_strided_slice %325 {offsets = [0, 0], sizes = [8, 128], strides = [1, 1]} : vector<8x256xf32> to vector<8x128xf32>
    %327 = vector.extract_strided_slice %323 {offsets = [0, 0], sizes = [8, 128], strides = [1, 1]} : vector<16x256xf32> to vector<8x128xf32>
    %328 = arith.addf %326, %327 : vector<8x128xf32>
    %329 = vector.extract_strided_slice %264 {offsets = [5, 0, 0], sizes = [1, 8, 256], strides = [1, 1, 1]} : vector<8x8x256xf32> to vector<1x8x256xf32>
    %330 = vector.shape_cast %329 : vector<1x8x256xf32> to vector<8x256xf32>
    %331 = vector.extract_strided_slice %330 {offsets = [0, 128], sizes = [8, 128], strides = [1, 1]} : vector<8x256xf32> to vector<8x128xf32>
    %332 = vector.extract_strided_slice %323 {offsets = [8, 128], sizes = [8, 128], strides = [1, 1]} : vector<16x256xf32> to vector<8x128xf32>
    %333 = arith.addf %331, %332 : vector<8x128xf32>
    %334 = tpu.concatenate %328, %333 in 0 : vector<8x128xf32>, vector<8x128xf32> -> vector<16x128xf32>
    %335 = arith.negf %334 : vector<16x128xf32>
    %336 = math.exp %335 : vector<16x128xf32>
    %cst_40 = arith.constant 1.000000e+00 : f32
    %337 = vector.broadcast %cst_40 : f32 to vector<16x128xf32>
    %338 = arith.addf %337, %336 : vector<16x128xf32>
    %339 = arith.divf %337, %338 : vector<16x128xf32>
    %340 = vector.extract_strided_slice %334 {offsets = [0, 64], sizes = [16, 32], strides = [1, 1]} : vector<16x128xf32> to vector<16x32xf32>
    %341 = math.tanh %340 : vector<16x32xf32>
    %342 = vector.extract_strided_slice %339 {offsets = [0, 32], sizes = [16, 32], strides = [1, 1]} : vector<16x128xf32> to vector<16x32xf32>
    %343 = arith.mulf %342, %318 : vector<16x32xf32>
    %344 = vector.extract_strided_slice %339 {offsets = [0, 0], sizes = [16, 32], strides = [1, 1]} : vector<16x128xf32> to vector<16x32xf32>
    %345 = arith.mulf %344, %341 : vector<16x32xf32>
    %346 = arith.addf %343, %345 : vector<16x32xf32>
    %347 = vector.extract_strided_slice %339 {offsets = [0, 96], sizes = [16, 32], strides = [1, 1]} : vector<16x128xf32> to vector<16x32xf32>
    %348 = math.tanh %346 : vector<16x32xf32>
    %349 = arith.mulf %347, %348 : vector<16x32xf32>
    %350 = arith.truncf %349 : vector<16x32xf32> to vector<16x32xbf16>
    %cst_41 = arith.constant dense<0.000000e+00> : vector<16x256xf32>
    %351 = tpu.matmul %350, %4, %cst_41 {dimension_numbers = #tpu.dot_dimension_numbers<[1], [0], [0], [1], [0, 0, 1, 1], [], []>} : vector<16x32xbf16>, vector<32x256xbf16>, vector<16x256xf32> -> vector<16x256xf32>
    %352 = vector.extract_strided_slice %264 {offsets = [3, 0, 0], sizes = [1, 8, 256], strides = [1, 1, 1]} : vector<8x8x256xf32> to vector<1x8x256xf32>
    %353 = vector.shape_cast %352 : vector<1x8x256xf32> to vector<8x256xf32>
    %354 = vector.extract_strided_slice %353 {offsets = [0, 0], sizes = [8, 128], strides = [1, 1]} : vector<8x256xf32> to vector<8x128xf32>
    %355 = vector.extract_strided_slice %351 {offsets = [0, 0], sizes = [8, 128], strides = [1, 1]} : vector<16x256xf32> to vector<8x128xf32>
    %356 = arith.addf %354, %355 : vector<8x128xf32>
    %357 = vector.extract_strided_slice %264 {offsets = [4, 0, 0], sizes = [1, 8, 256], strides = [1, 1, 1]} : vector<8x8x256xf32> to vector<1x8x256xf32>
    %358 = vector.shape_cast %357 : vector<1x8x256xf32> to vector<8x256xf32>
    %359 = vector.extract_strided_slice %358 {offsets = [0, 128], sizes = [8, 128], strides = [1, 1]} : vector<8x256xf32> to vector<8x128xf32>
    %360 = vector.extract_strided_slice %351 {offsets = [8, 128], sizes = [8, 128], strides = [1, 1]} : vector<16x256xf32> to vector<8x128xf32>
    %361 = arith.addf %359, %360 : vector<8x128xf32>
    %362 = tpu.concatenate %356, %361 in 0 : vector<8x128xf32>, vector<8x128xf32> -> vector<16x128xf32>
    %363 = arith.negf %362 : vector<16x128xf32>
    %364 = math.exp %363 : vector<16x128xf32>
    %cst_42 = arith.constant 1.000000e+00 : f32
    %365 = vector.broadcast %cst_42 : f32 to vector<16x128xf32>
    %366 = arith.addf %365, %364 : vector<16x128xf32>
    %367 = arith.divf %365, %366 : vector<16x128xf32>
    %368 = vector.extract_strided_slice %362 {offsets = [0, 64], sizes = [16, 32], strides = [1, 1]} : vector<16x128xf32> to vector<16x32xf32>
    %369 = math.tanh %368 : vector<16x32xf32>
    %370 = vector.extract_strided_slice %367 {offsets = [0, 32], sizes = [16, 32], strides = [1, 1]} : vector<16x128xf32> to vector<16x32xf32>
    %371 = arith.mulf %370, %346 : vector<16x32xf32>
    %372 = vector.extract_strided_slice %367 {offsets = [0, 0], sizes = [16, 32], strides = [1, 1]} : vector<16x128xf32> to vector<16x32xf32>
    %373 = arith.mulf %372, %369 : vector<16x32xf32>
    %374 = arith.addf %371, %373 : vector<16x32xf32>
    %375 = vector.extract_strided_slice %367 {offsets = [0, 96], sizes = [16, 32], strides = [1, 1]} : vector<16x128xf32> to vector<16x32xf32>
    %376 = math.tanh %374 : vector<16x32xf32>
    %377 = arith.mulf %375, %376 : vector<16x32xf32>
    %378 = arith.truncf %377 : vector<16x32xf32> to vector<16x32xbf16>
    %cst_43 = arith.constant dense<0.000000e+00> : vector<16x256xf32>
    %379 = tpu.matmul %378, %4, %cst_43 {dimension_numbers = #tpu.dot_dimension_numbers<[1], [0], [0], [1], [0, 0, 1, 1], [], []>} : vector<16x32xbf16>, vector<32x256xbf16>, vector<16x256xf32> -> vector<16x256xf32>
    %380 = vector.extract_strided_slice %264 {offsets = [4, 0, 0], sizes = [1, 8, 256], strides = [1, 1, 1]} : vector<8x8x256xf32> to vector<1x8x256xf32>
    %381 = vector.shape_cast %380 : vector<1x8x256xf32> to vector<8x256xf32>
    %382 = vector.extract_strided_slice %381 {offsets = [0, 0], sizes = [8, 128], strides = [1, 1]} : vector<8x256xf32> to vector<8x128xf32>
    %383 = vector.extract_strided_slice %379 {offsets = [0, 0], sizes = [8, 128], strides = [1, 1]} : vector<16x256xf32> to vector<8x128xf32>
    %384 = arith.addf %382, %383 : vector<8x128xf32>
    %385 = vector.extract_strided_slice %264 {offsets = [3, 0, 0], sizes = [1, 8, 256], strides = [1, 1, 1]} : vector<8x8x256xf32> to vector<1x8x256xf32>
    %386 = vector.shape_cast %385 : vector<1x8x256xf32> to vector<8x256xf32>
    %387 = vector.extract_strided_slice %386 {offsets = [0, 128], sizes = [8, 128], strides = [1, 1]} : vector<8x256xf32> to vector<8x128xf32>
    %388 = vector.extract_strided_slice %379 {offsets = [8, 128], sizes = [8, 128], strides = [1, 1]} : vector<16x256xf32> to vector<8x128xf32>
    %389 = arith.addf %387, %388 : vector<8x128xf32>
    %390 = tpu.concatenate %384, %389 in 0 : vector<8x128xf32>, vector<8x128xf32> -> vector<16x128xf32>
    %391 = arith.negf %390 : vector<16x128xf32>
    %392 = math.exp %391 : vector<16x128xf32>
    %cst_44 = arith.constant 1.000000e+00 : f32
    %393 = vector.broadcast %cst_44 : f32 to vector<16x128xf32>
    %394 = arith.addf %393, %392 : vector<16x128xf32>
    %395 = arith.divf %393, %394 : vector<16x128xf32>
    %396 = vector.extract_strided_slice %390 {offsets = [0, 64], sizes = [16, 32], strides = [1, 1]} : vector<16x128xf32> to vector<16x32xf32>
    %397 = math.tanh %396 : vector<16x32xf32>
    %398 = vector.extract_strided_slice %395 {offsets = [0, 32], sizes = [16, 32], strides = [1, 1]} : vector<16x128xf32> to vector<16x32xf32>
    %399 = arith.mulf %398, %374 : vector<16x32xf32>
    %400 = vector.extract_strided_slice %395 {offsets = [0, 0], sizes = [16, 32], strides = [1, 1]} : vector<16x128xf32> to vector<16x32xf32>
    %401 = arith.mulf %400, %397 : vector<16x32xf32>
    %402 = arith.addf %399, %401 : vector<16x32xf32>
    %403 = vector.extract_strided_slice %395 {offsets = [0, 96], sizes = [16, 32], strides = [1, 1]} : vector<16x128xf32> to vector<16x32xf32>
    %404 = math.tanh %402 : vector<16x32xf32>
    %405 = arith.mulf %403, %404 : vector<16x32xf32>
    %406 = arith.truncf %405 : vector<16x32xf32> to vector<16x32xbf16>
    %cst_45 = arith.constant dense<0.000000e+00> : vector<16x256xf32>
    %407 = tpu.matmul %406, %4, %cst_45 {dimension_numbers = #tpu.dot_dimension_numbers<[1], [0], [0], [1], [0, 0, 1, 1], [], []>} : vector<16x32xbf16>, vector<32x256xbf16>, vector<16x256xf32> -> vector<16x256xf32>
    %408 = vector.extract_strided_slice %264 {offsets = [5, 0, 0], sizes = [1, 8, 256], strides = [1, 1, 1]} : vector<8x8x256xf32> to vector<1x8x256xf32>
    %409 = vector.shape_cast %408 : vector<1x8x256xf32> to vector<8x256xf32>
    %410 = vector.extract_strided_slice %409 {offsets = [0, 0], sizes = [8, 128], strides = [1, 1]} : vector<8x256xf32> to vector<8x128xf32>
    %411 = vector.extract_strided_slice %407 {offsets = [0, 0], sizes = [8, 128], strides = [1, 1]} : vector<16x256xf32> to vector<8x128xf32>
    %412 = arith.addf %410, %411 : vector<8x128xf32>
    %413 = vector.extract_strided_slice %264 {offsets = [2, 0, 0], sizes = [1, 8, 256], strides = [1, 1, 1]} : vector<8x8x256xf32> to vector<1x8x256xf32>
    %414 = vector.shape_cast %413 : vector<1x8x256xf32> to vector<8x256xf32>
    %415 = vector.extract_strided_slice %414 {offsets = [0, 128], sizes = [8, 128], strides = [1, 1]} : vector<8x256xf32> to vector<8x128xf32>
    %416 = vector.extract_strided_slice %407 {offsets = [8, 128], sizes = [8, 128], strides = [1, 1]} : vector<16x256xf32> to vector<8x128xf32>
    %417 = arith.addf %415, %416 : vector<8x128xf32>
    %418 = tpu.concatenate %412, %417 in 0 : vector<8x128xf32>, vector<8x128xf32> -> vector<16x128xf32>
    %419 = arith.negf %418 : vector<16x128xf32>
    %420 = math.exp %419 : vector<16x128xf32>
    %cst_46 = arith.constant 1.000000e+00 : f32
    %421 = vector.broadcast %cst_46 : f32 to vector<16x128xf32>
    %422 = arith.addf %421, %420 : vector<16x128xf32>
    %423 = arith.divf %421, %422 : vector<16x128xf32>
    %424 = vector.extract_strided_slice %418 {offsets = [0, 64], sizes = [16, 32], strides = [1, 1]} : vector<16x128xf32> to vector<16x32xf32>
    %425 = math.tanh %424 : vector<16x32xf32>
    %426 = vector.extract_strided_slice %423 {offsets = [0, 32], sizes = [16, 32], strides = [1, 1]} : vector<16x128xf32> to vector<16x32xf32>
    %427 = arith.mulf %426, %402 : vector<16x32xf32>
    %428 = vector.extract_strided_slice %423 {offsets = [0, 0], sizes = [16, 32], strides = [1, 1]} : vector<16x128xf32> to vector<16x32xf32>
    %429 = arith.mulf %428, %425 : vector<16x32xf32>
    %430 = arith.addf %427, %429 : vector<16x32xf32>
    %431 = vector.extract_strided_slice %423 {offsets = [0, 96], sizes = [16, 32], strides = [1, 1]} : vector<16x128xf32> to vector<16x32xf32>
    %432 = math.tanh %430 : vector<16x32xf32>
    %433 = arith.mulf %431, %432 : vector<16x32xf32>
    %434 = arith.truncf %433 : vector<16x32xf32> to vector<16x32xbf16>
    %cst_47 = arith.constant dense<0.000000e+00> : vector<16x256xf32>
    %435 = tpu.matmul %434, %4, %cst_47 {dimension_numbers = #tpu.dot_dimension_numbers<[1], [0], [0], [1], [0, 0, 1, 1], [], []>} : vector<16x32xbf16>, vector<32x256xbf16>, vector<16x256xf32> -> vector<16x256xf32>
    %436 = vector.extract_strided_slice %264 {offsets = [6, 0, 0], sizes = [1, 8, 256], strides = [1, 1, 1]} : vector<8x8x256xf32> to vector<1x8x256xf32>
    %437 = vector.shape_cast %436 : vector<1x8x256xf32> to vector<8x256xf32>
    %438 = vector.extract_strided_slice %437 {offsets = [0, 0], sizes = [8, 128], strides = [1, 1]} : vector<8x256xf32> to vector<8x128xf32>
    %439 = vector.extract_strided_slice %435 {offsets = [0, 0], sizes = [8, 128], strides = [1, 1]} : vector<16x256xf32> to vector<8x128xf32>
    %440 = arith.addf %438, %439 : vector<8x128xf32>
    %441 = vector.extract_strided_slice %264 {offsets = [1, 0, 0], sizes = [1, 8, 256], strides = [1, 1, 1]} : vector<8x8x256xf32> to vector<1x8x256xf32>
    %442 = vector.shape_cast %441 : vector<1x8x256xf32> to vector<8x256xf32>
    %443 = vector.extract_strided_slice %442 {offsets = [0, 128], sizes = [8, 128], strides = [1, 1]} : vector<8x256xf32> to vector<8x128xf32>
    %444 = vector.extract_strided_slice %435 {offsets = [8, 128], sizes = [8, 128], strides = [1, 1]} : vector<16x256xf32> to vector<8x128xf32>
    %445 = arith.addf %443, %444 : vector<8x128xf32>
    %446 = tpu.concatenate %440, %445 in 0 : vector<8x128xf32>, vector<8x128xf32> -> vector<16x128xf32>
    %447 = arith.negf %446 : vector<16x128xf32>
    %448 = math.exp %447 : vector<16x128xf32>
    %cst_48 = arith.constant 1.000000e+00 : f32
    %449 = vector.broadcast %cst_48 : f32 to vector<16x128xf32>
    %450 = arith.addf %449, %448 : vector<16x128xf32>
    %451 = arith.divf %449, %450 : vector<16x128xf32>
    %452 = vector.extract_strided_slice %446 {offsets = [0, 64], sizes = [16, 32], strides = [1, 1]} : vector<16x128xf32> to vector<16x32xf32>
    %453 = math.tanh %452 : vector<16x32xf32>
    %454 = vector.extract_strided_slice %451 {offsets = [0, 32], sizes = [16, 32], strides = [1, 1]} : vector<16x128xf32> to vector<16x32xf32>
    %455 = arith.mulf %454, %430 : vector<16x32xf32>
    %456 = vector.extract_strided_slice %451 {offsets = [0, 0], sizes = [16, 32], strides = [1, 1]} : vector<16x128xf32> to vector<16x32xf32>
    %457 = arith.mulf %456, %453 : vector<16x32xf32>
    %458 = arith.addf %455, %457 : vector<16x32xf32>
    %459 = vector.extract_strided_slice %451 {offsets = [0, 96], sizes = [16, 32], strides = [1, 1]} : vector<16x128xf32> to vector<16x32xf32>
    %460 = math.tanh %458 : vector<16x32xf32>
    %461 = arith.mulf %459, %460 : vector<16x32xf32>
    %462 = arith.truncf %461 : vector<16x32xf32> to vector<16x32xbf16>
    %cst_49 = arith.constant dense<0.000000e+00> : vector<16x256xf32>
    %463 = tpu.matmul %462, %4, %cst_49 {dimension_numbers = #tpu.dot_dimension_numbers<[1], [0], [0], [1], [0, 0, 1, 1], [], []>} : vector<16x32xbf16>, vector<32x256xbf16>, vector<16x256xf32> -> vector<16x256xf32>
    %464 = vector.extract_strided_slice %264 {offsets = [7, 0, 0], sizes = [1, 8, 256], strides = [1, 1, 1]} : vector<8x8x256xf32> to vector<1x8x256xf32>
    %465 = vector.shape_cast %464 : vector<1x8x256xf32> to vector<8x256xf32>
    %466 = vector.extract_strided_slice %465 {offsets = [0, 0], sizes = [8, 128], strides = [1, 1]} : vector<8x256xf32> to vector<8x128xf32>
    %467 = vector.extract_strided_slice %463 {offsets = [0, 0], sizes = [8, 128], strides = [1, 1]} : vector<16x256xf32> to vector<8x128xf32>
    %468 = arith.addf %466, %467 : vector<8x128xf32>
    %469 = vector.extract_strided_slice %264 {offsets = [0, 0, 0], sizes = [1, 8, 256], strides = [1, 1, 1]} : vector<8x8x256xf32> to vector<1x8x256xf32>
    %470 = vector.shape_cast %469 : vector<1x8x256xf32> to vector<8x256xf32>
    %471 = vector.extract_strided_slice %470 {offsets = [0, 128], sizes = [8, 128], strides = [1, 1]} : vector<8x256xf32> to vector<8x128xf32>
    %472 = vector.extract_strided_slice %463 {offsets = [8, 128], sizes = [8, 128], strides = [1, 1]} : vector<16x256xf32> to vector<8x128xf32>
    %473 = arith.addf %471, %472 : vector<8x128xf32>
    %474 = tpu.concatenate %468, %473 in 0 : vector<8x128xf32>, vector<8x128xf32> -> vector<16x128xf32>
    %475 = arith.negf %474 : vector<16x128xf32>
    %476 = math.exp %475 : vector<16x128xf32>
    %cst_50 = arith.constant 1.000000e+00 : f32
    %477 = vector.broadcast %cst_50 : f32 to vector<16x128xf32>
    %478 = arith.addf %477, %476 : vector<16x128xf32>
    %479 = arith.divf %477, %478 : vector<16x128xf32>
    %480 = vector.extract_strided_slice %474 {offsets = [0, 64], sizes = [16, 32], strides = [1, 1]} : vector<16x128xf32> to vector<16x32xf32>
    %481 = math.tanh %480 : vector<16x32xf32>
    %482 = vector.extract_strided_slice %479 {offsets = [0, 32], sizes = [16, 32], strides = [1, 1]} : vector<16x128xf32> to vector<16x32xf32>
    %483 = arith.mulf %482, %458 : vector<16x32xf32>
    %484 = vector.extract_strided_slice %479 {offsets = [0, 0], sizes = [16, 32], strides = [1, 1]} : vector<16x128xf32> to vector<16x32xf32>
    %485 = arith.mulf %484, %481 : vector<16x32xf32>
    %486 = arith.addf %483, %485 : vector<16x32xf32>
    %487 = vector.extract_strided_slice %479 {offsets = [0, 96], sizes = [16, 32], strides = [1, 1]} : vector<16x128xf32> to vector<16x32xf32>
    %488 = math.tanh %486 : vector<16x32xf32>
    %489 = arith.mulf %487, %488 : vector<16x32xf32>
    %490 = arith.truncf %489 : vector<16x32xf32> to vector<16x32xbf16>
    %491 = vector.extract_strided_slice %490 {offsets = [0, 0], sizes = [8, 32], strides = [1, 1]} : vector<16x32xbf16> to vector<8x32xbf16>
    %492 = vector.extract_strided_slice %490 {offsets = [8, 0], sizes = [8, 32], strides = [1, 1]} : vector<16x32xbf16> to vector<8x32xbf16>
    %c0_51 = arith.constant 0 : index
    %c0_52 = arith.constant 0 : index
    %493 = vector.load %arg2[%c0_51, %c0_52] : memref<96x32xbf16, #tpu.memory_space<vmem>>, vector<32x32xbf16>
    %cst_53 = arith.constant dense<0.000000e+00> : vector<8x32xf32>
    %494 = tpu.matmul %491, %493, %cst_53 {dimension_numbers = #tpu.dot_dimension_numbers<[1], [0], [0], [1], [0, 0, 1, 1], [], []>} : vector<8x32xbf16>, vector<32x32xbf16>, vector<8x32xf32> -> vector<8x32xf32>
    %c32 = arith.constant 32 : index
    %c0_54 = arith.constant 0 : index
    %495 = vector.load %arg2[%c32, %c0_54] : memref<96x32xbf16, #tpu.memory_space<vmem>>, vector<32x32xbf16>
    %cst_55 = arith.constant dense<0.000000e+00> : vector<8x32xf32>
    %496 = tpu.matmul %492, %495, %cst_55 {dimension_numbers = #tpu.dot_dimension_numbers<[1], [0], [0], [1], [0, 0, 1, 1], [], []>} : vector<8x32xbf16>, vector<32x32xbf16>, vector<8x32xf32> -> vector<8x32xf32>
    %497 = arith.addf %494, %496 : vector<8x32xf32>
    %498 = vector.broadcast %7 : vector<1x32xf32> to vector<8x32xf32>
    %499 = arith.addf %497, %498 : vector<8x32xf32>
    %cst_56 = arith.constant 0.000000e+00 : f32
    %500 = vector.broadcast %cst_56 : f32 to vector<8x32xf32>
    %501 = arith.maximumf %499, %500 : vector<8x32xf32>
    %502 = arith.truncf %501 : vector<8x32xf32> to vector<8x32xbf16>
    %c64 = arith.constant 64 : index
    %c0_57 = arith.constant 0 : index
    %503 = vector.load %arg2[%c64, %c0_57] : memref<96x32xbf16, #tpu.memory_space<vmem>>, vector<32x32xbf16>
    %cst_58 = arith.constant dense<0.000000e+00> : vector<8x32xf32>
    %504 = tpu.matmul %502, %503, %cst_58 {dimension_numbers = #tpu.dot_dimension_numbers<[1], [0], [0], [1], [0, 0, 1, 1], [], []>} : vector<8x32xbf16>, vector<32x32xbf16>, vector<8x32xf32> -> vector<8x32xf32>
    %505 = vector.broadcast %8 : vector<1x32xf32> to vector<8x32xf32>
    %506 = arith.addf %504, %505 : vector<8x32xf32>
    %c0_59 = arith.constant 0 : index
    %c0_60 = arith.constant 0 : index
    %507 = vector.load %arg4[%c0_59, %c0_60] : memref<8x32xf32, #tpu.memory_space<vmem>>, vector<8x32xf32>
    tpu.vector_store %arg4[%c0_59, %c0_60], %506 {strides = array<i32>} : memref<8x32xf32, #tpu.memory_space<vmem>>, vector<8x32xf32>,
    return
  }
}

</mosaic_0001>

<bundles_post_ra>
// kernel: lstm_compressor_forward.1
= control target key start
LH: loop header
LB: loop body
LE: loop exit
PB: predicated region body
PF: predicated region fallthrough
CT: control target
= control target key end

     0   :  { %9 = vsyncpa [#allocation3], 0  ;;  %s2721_s15 = smov [#allocation2]   ;;  %s3198_s0 = inlined_call_operand.vmem [shape: bf16[8,8,16], index: 0, kind: input, shape index: {}]   ;;  %s3199_s1 = inlined_call_operand.hbm [shape: bf16[144,256], index: 1, kind: input, shape index: {}]   ;;  %s3200_s2 = inlined_call_operand.vmem [shape: bf16[96,32], index: 2, kind: input, shape index: {}]   ;;  %s3201_s3 = inlined_call_operand.vmem [shape: f32[4,256], index: 3, kind: input, shape index: {}]   ;;  %s3202_s4 = inlined_call_operand.vmem [shape: f32[8,32], index: 4, kind: output, shape index: {}]  }
   0x1   :  { %s17_s16 = sshll.u32 %s2721_s15, 4  ;;  %s18_s16 = int_to_ptr.vmem [resolvable:$true] %s17_s16 }
   0x2   :  { %s2707_s17 = scalar_lea.vmem %s18_s16, 2304  ;;  %p2712_p1 = scmp.lt.s32.totalorder %s18_s16, %s18_s16 }
   0x3   :  { %p2708_p0 = scmp.ne.s32.totalorder %s18_s16, %s2707_s17  ;;  %p2713_p2 = scmp.lt.s32.totalorder %s2707_s17, %s2707_s17 }
   0x5   :  { %p2714_p3 = por %p2713_p2, %p2712_p1 }
   0x7   :  { %p2715_p4 = pnand %p2714_p3, %p2708_p0 }
   0x9   :  { %2718 = shalt.err (!%p2715_p4)
}
   0xa   :  { %s2722_s18 = smov 128   ;;  %s2723_s19 = smov 8  }
   0xb   :  { %23 = dma.hbm_to_vmem [thread:$0]  %s3199_s1, 2304, %s18_s16, [#allocation3], %s2722_s18, %s2722_s18, %s2723_s19  }
   0xc   :  { %2719 = dma.done.wait [#allocation3], 2304  }
   0xd   :  { %2720 = vsyncadd [#allocation3], 4294964992  ;;  %v2724_v0 = vmov 0   ;;  %v2406_v1 = vld [vmem:[#allocation2 + $0x4] ss:$8 sps:$4 sm:$0xff]   ;;  %vm104_vm0 = vcmask 130048   ;;  %v64_v11 = vlaneseq }
   0xe   :  { %149 = vmatprep.mubr.bf16.mxu0 %v2724_v0  ;;  %246 = vmatprep.mubr.bf16.mxu1 %v2724_v0  ;;  %v2759_v2 = vld [vmem:[#allocation2 + $0x24] ss:$8 sps:$4 sm:$0xff]   ;;  %v2410_v3 = vld [vmem:[#allocation2] ss:$8 sps:$4 sm:$0xff]   ;;  %v2768_v6 = vld [vmem:[#allocation2 + $0x14] ss:$8 sps:$4 sm:$0xff]  }
   0xf   :  { %131 = vmatprep.subr.bf16.mxu0 %v2406_v1  ;;  %v2761_v4 = vld [vmem:[#allocation2 + $0x20] ss:$8 sps:$4 sm:$0xff]   ;;  %226 = vmatprep.subr.bf16.mxu1 %v2759_v2  ;;  %v2770_v7 = vld [vmem:[#allocation2 + $0x10] ss:$8 sps:$4 sm:$0xff]   ;;  %v2803_v12 = vshrl.u32 %v64_v11, 7  ;;  %s2726_s5 = smov 32  }
  0x10   :  { %v2412_v5 = vld [vmem:[%s3198_s0] sm:$0xff]   ;;  %132 = vmatpush1.bf16.msra.mxu0 %v2410_v3  ;;  %227 = vmatpush1.bf16.msra.mxu1 %v2761_v4  ;;  %v2416_v8 = vld [vmem:[%s3198_s0 + $0x8] sm:$0xff]   ;;  %v2417_v9 = vld [vmem:[%s3198_s0 + $0x10] sm:$0xff]   ;;  %vm210_vm1 = vcmask 261120   ;;  %vm997_vm2 = vcmask 1043456   ;;  %vm2728_vm3 = vmmov 0  }
  0x11   :  { %618 = vmatprep.subr.bf16.mxu0 %v2759_v2  ;;  %228 = vmatprep.subr.bf16.mxu1 %v2768_v6  ;;  %v2418_v10 = vld [vmem:[%s3198_s0 + $0x18] sm:$0xff]   ;;  %v66_v13 = vsub.s32 0, %v2803_v12  ;;  %v70_v14 = vsub.s32 1, %v2803_v12  ;;  %v50_v15 = vld [vmem:[%s3201_s3] ss:$4 sm:$0x3] }
  0x12   :  { %s2725_s0 = smov 64  }
  0x13   :  { %2280 = vmatmul.mubr.msk.bf16.vlgmr.msra.gmra.mxu0 %vm104_vm0, %v2412_v5  ;;  %v67_v16 = vrot.slane %v50_v15, %v66_v13  ;;  %v71_v17 = vrot.slane %v50_v15, %v70_v14 }
  0x14   :  { %229 = vmatpush1.bf16.msra.mxu1 %v2770_v7  ;;  %159 = vmatprep.mubr.bf16.mxu0 %v2724_v0 }
  0x15   :  { %324 = vmatprep.subr.bf16.mxu1 %v2759_v2  ;;  %619 = vmatpush1.bf16.msra.mxu0 %v2761_v4 }
  0x16   :  { %620 = vmatprep.subr.bf16.mxu0 %v2768_v6 }
  0x17   :  { %247 = vmatmul.mubr.bf16.vlgmr.msra.gmra.mxu1 %v2724_v0 }
  0x18   :  { %325 = vmatpush1.bf16.msra.mxu1 %v2761_v4  ;;  %344 = vmatprep.mubr.bf16.mxu1 %v2724_v0 }
  0x19   :  { %326 = vmatprep.subr.bf16.mxu1 %v2768_v6  ;;  %621 = vmatpush1.bf16.msra.mxu0 %v2770_v7 }
  0x1a   :  { %814 = vmatprep.subr.bf16.mxu0 %v2759_v2 }
  0x1b   :  { %2281 = vmatmul.mubr.msk.bf16.gmra.mxu0 %vm104_vm0, %v2416_v8 }
  0x1c   :  { %169 = vmatprep.mubr.bf16.mxu0 %v2724_v0  ;;  %327 = vmatpush1.bf16.msra.mxu1 %v2770_v7 }
  0x1d   :  { %422 = vmatprep.subr.bf16.mxu1 %v2759_v2 }
  0x23   :  { %2282 = vmatmul.mubr.msk.bf16.gmra.mxu0 %vm104_vm0, %v2417_v9 }
  0x24   :  { %179 = vmatprep.mubr.bf16.mxu0 %v2724_v0 }
  0x2b   :  { %2283 = vmatmul.mubr.msk.bf16.gmra.mxu0 %vm104_vm0, %v2418_v10 }
  0x2c   :  { %638 = vmatprep.mubr.bf16.mxu0 %v2724_v0 }
  0xd3   :  { %v151_v18 = vpop.f32.mrf.mxu0 }
  0xd4   :  { %v152_v20 = vadd.f32 %v151_v18, %v67_v16 }
  0xd5   :  { %v153_v19 = vpop.f32.mrf.mxu0 }
  0xd6   :  { %v2814_v21 = vadd.f32 %v153_v19, %v71_v17 }
  0xd7   :  { %v155_v22 = vpop.f32.mrf.mxu0  ;;  %v248_v23 = vpop.f32.mrf.mxu1 }
  0xd8   :  { %v2816_v24 = vadd.f32 %v155_v22, %v67_v16  ;;  %v255_v25 = vadd.f32 %v248_v23, %v152_v20 }
  0xd9   :  { %v157_v26 = vpop.f32.mrf.mxu0  ;;  %v250_v27 = vpop.f32.mrf.mxu1 }
  0xda   :  { %2443 = vtanh.f32 %v255_v25  ;;  %v2818_v28 = vadd.f32 %v157_v26, %v71_v17  ;;  %v2288_v58 = vmul.f32 -1.442695, %v255_v25 }
  0xdb   :  { %v161_v29 = vpop.f32.mrf.mxu0  ;;  %v251_v30 = vpop.f32.mrf.mxu1 }
  0xdc   :  { %v2820_v31 = vadd.f32 %v161_v29, %v67_v16 }
  0xdd   :  { %v163_v32 = vpop.f32.mrf.mxu0  ;;  %v252_v55 = vpop.f32.mrf.mxu1 }
  0xde   :  { %v2822_v33 = vadd.f32 %v163_v32, %v71_v17 }
  0xdf   :  { %v165_v34 = vpop.f32.mrf.mxu0 }
  0xe0   :  { %v2824_v35 = vadd.f32 %v165_v34, %v67_v16 }
  0xe1   :  { %v167_v36 = vpop.f32.mrf.mxu0 }
  0xe2   :  { %v2826_v37 = vadd.f32 %v167_v36, %v71_v17 }
  0xe3   :  { %v171_v38 = vpop.f32.mrf.mxu0 }
  0xe4   :  { %v2828_v39 = vadd.f32 %v171_v38, %v67_v16 }
  0xe5   :  { %v173_v40 = vpop.f32.mrf.mxu0 }
  0xe6   :  { %v2830_v41 = vadd.f32 %v173_v40, %v71_v17 }
  0xe7   :  { %v2444_v42 = vpop.eup %2443  ;;  %v175_v43 = vpop.f32.mrf.mxu0 }
  0xe8   :  { %v2832_v44 = vadd.f32 %v175_v43, %v67_v16  ;;  %275 = vrot.lane.b32.xlu0 %v2444_v42, %s2725_s0 }
  0xe9   :  { %v177_v45 = vpop.f32.mrf.mxu0 }
  0xea   :  { %v2835_v46 = vadd.f32 %v177_v45, %v71_v17 }
  0xeb   :  { %v181_v47 = vpop.f32.mrf.mxu0 }
  0xec   :  { %v2837_v48 = vadd.f32 %v181_v47, %v67_v16 }
  0xed   :  { %v183_v49 = vpop.f32.mrf.mxu0 }
  0xee   :  { %v184_v50 = vadd.f32 %v183_v49, %v71_v17 }
  0xef   :  { %v185_v51 = vpop.f32.mrf.mxu0 }
  0xf0   :  { %v2839_v52 = vadd.f32 %v185_v51, %v67_v16 }
  0xf1   :  { %v187_v53 = vpop.f32.mrf.mxu0 }
  0xf2   :  { %v188_v54 = vadd.f32 %v187_v53, %v71_v17 }
  0xf4   :  { %v256_v56 = vadd.f32 %v252_v55, %v188_v54 }
  0xf6   :  { %2445 = vtanh.f32 %v256_v56  ;;  %v2289_v61 = vmul.f32 -1.442695, %v256_v56 }
  0xf7   :  { %2447 = vpow2.f32 %v2288_v58 }
 0x103   :  { %v2446_v57 = vpop.eup %2445 }
 0x104   :  { %277 = vrot.lane.b32.xlu0 %v2446_v57, %s2725_s0  ;;  %v2448_v59 = vpop.eup %2447 }
 0x105   :  { %v263_v60 = vadd.f32 1.0, %v2448_v59 }
 0x107   :  { %2449 = vrcp.f32 %v263_v60 }
 0x108   :  { %2451 = vpow2.f32 %v2289_v61 }
 0x114   :  { %v2450_v62 = vpop.eup %2449 }
 0x115   :  { %v2452_v3 = vpop.eup %2451  ;;  %v271_v11 = vmul.f32 0.0, %v2450_v62 }
 0x116   :  { %v264_v5 = vadd.f32 1.0, %v2452_v3 }
 0x118   :  { %2453 = vrcp.f32 %v264_v5 }
 0x125   :  { %v2454_v8 = vpop.eup %2453 }
 0x126   :  { %v272_v18 = vmul.f32 0.0, %v2454_v8 }
 0x15a   :  { %v276_v63 = vpop.permute.xlu0 %275 }
 0x15b   :  { %v281_v1 = vmul.f32 %v2450_v62, %v276_v63 }
 0x15d   :  { %285 = vrot.lane.b32.xlu1 %v281_v1, %s2726_s5 }
 0x176   :  { %v278_v9 = vpop.permute.xlu0 %277 }
 0x177   :  { %v282_v10 = vmul.f32 %v2454_v8, %v278_v9 }
 0x179   :  { %287 = vrot.lane.b32.xlu1 %v282_v10, %s2726_s5 }
 0x1cf   :  { %v286_v15 = vpop.permute.xlu1 %285 }
 0x1d0   :  { %v291_v16 = vadd.f32 %v286_v15, %v271_v11 }
 0x1d2   :  { %2455 = vtanh.f32 %v291_v16 }
 0x1df   :  { %v2456_v17 = vpop.eup %2455 }
 0x1e0   :  { %297 = vrot.lane.b32.xlu0 %v2456_v17, %s2725_s0 }
 0x1eb   :  { %v288_v19 = vpop.permute.xlu1 %287 }
 0x1ec   :  { %v292_v20 = vadd.f32 %v288_v19, %v272_v18 }
 0x1ee   :  { %2457 = vtanh.f32 %v292_v20 }
 0x1fb   :  { %v2458_v22 = vpop.eup %2457 }
 0x1fc   :  { %299 = vrot.lane.b32.xlu1 %v2458_v22, %s2725_s0 }
 0x252   :  { %v298_v23 = vpop.permute.xlu0 %297 }
 0x253   :  { %v303_v26 = vmul.f32 %v2450_v62, %v298_v23 }
 0x26e   :  { %v300_v25 = vpop.permute.xlu1 %299 }
 0x26f   :  { %v304_v27 = vmul.f32 %v2454_v8, %v300_v25 }
 0x271   :  { %v2846_v29 = vpack.c.bf16 %v304_v27, %v303_v26 }
 0x273   :  { %307 = vrot.lane.b32.xlu0 %v2846_v29, %s2726_s5 }
 0x2e5   :  { %v308_v30 = vpop.permute.xlu0 %307 }
 0x2e6   :  { %2290 = vmatmul.mubr.msk.bf16.vlgmr.msra.gmra.mxu1 %vm210_vm1, %v308_v30 }
 0x2e7   :  { %423 = vmatpush1.bf16.msra.mxu1 %v2761_v4  ;;  %442 = vmatprep.mubr.bf16.mxu1 %v2724_v0 }
 0x2e8   :  { %424 = vmatprep.subr.bf16.mxu1 %v2768_v6 }
 0x2eb   :  { %425 = vmatpush1.bf16.msra.mxu1 %v2770_v7 }
 0x2ec   :  { %520 = vmatprep.subr.bf16.mxu1 %v2759_v2 }
 0x3a6   :  { %v346_v32 = vpop.f32.mrf.mxu1 }
 0x3a7   :  { %v353_v34 = vadd.f32 %v346_v32, %v2816_v24 }
 0x3a8   :  { %v348_v36 = vpop.f32.mrf.mxu1 }
 0x3a9   :  { %2459 = vtanh.f32 %v353_v34  ;;  %v2291_v47 = vmul.f32 -1.442695, %v353_v34 }
 0x3aa   :  { %v349_v38 = vpop.f32.mrf.mxu1 }
 0x3ac   :  { %v350_v40 = vpop.f32.mrf.mxu1 }
 0x3ad   :  { %v354_v42 = vadd.f32 %v350_v40, %v184_v50 }
 0x3af   :  { %2461 = vtanh.f32 %v354_v42  ;;  %v2292_v49 = vmul.f32 -1.442695, %v354_v42 }
 0x3b0   :  { %2463 = vpow2.f32 %v2291_v47 }
 0x3b1   :  { %2465 = vpow2.f32 %v2292_v49 }
 0x3b6   :  { %v2460_v43 = vpop.eup %2459 }
 0x3b7   :  { %373 = vrot.lane.b32.xlu1 %v2460_v43, %s2725_s0 }
 0x3bc   :  { %v2462_v45 = vpop.eup %2461 }
 0x3bd   :  { %375 = vrot.lane.b32.xlu0 %v2462_v45, %s2725_s0  ;;  %v2464_v51 = vpop.eup %2463 }
 0x3be   :  { %v361_v53 = vadd.f32 1.0, %v2464_v51  ;;  %v2466_v54 = vpop.eup %2465 }
 0x3bf   :  { %v362_v24 = vadd.f32 1.0, %v2466_v54 }
 0x3c0   :  { %2467 = vrcp.f32 %v361_v53 }
 0x3c1   :  { %2469 = vrcp.f32 %v362_v24 }
 0x3cd   :  { %v2468_v55 = vpop.eup %2467 }
 0x3ce   :  { %v2470_v57 = vpop.eup %2469  ;;  %v369_v60 = vmul.f32 %v2468_v55, %v291_v16 }
 0x3cf   :  { %v370_v63 = vmul.f32 %v2470_v57, %v292_v20 }
 0x429   :  { %v374_v56 = vpop.permute.xlu1 %373 }
 0x42a   :  { %v379_v50 = vmul.f32 %v2468_v55, %v374_v56 }
 0x42c   :  { %383 = vrot.lane.b32.xlu1 %v379_v50, %s2726_s5 }
 0x42f   :  { %v376_v58 = vpop.permute.xlu0 %375 }
 0x430   :  { %v380_v59 = vmul.f32 %v2470_v57, %v376_v58 }
 0x432   :  { %385 = vrot.lane.b32.xlu0 %v380_v59, %s2726_s5 }
 0x49e   :  { %v384_v61 = vpop.permute.xlu1 %383 }
 0x49f   :  { %v389_v62 = vadd.f32 %v384_v61, %v369_v60 }
 0x4a1   :  { %2471 = vtanh.f32 %v389_v62 }
 0x4a4   :  { %v386_v1 = vpop.permute.xlu0 %385 }
 0x4a5   :  { %v390_v3 = vadd.f32 %v386_v1, %v370_v63 }
 0x4a7   :  { %2473 = vtanh.f32 %v390_v3 }
 0x4ae   :  { %v2472_v5 = vpop.eup %2471 }
 0x4af   :  { %395 = vrot.lane.b32.xlu1 %v2472_v5, %s2725_s0 }
 0x4b4   :  { %v2474_v8 = vpop.eup %2473 }
 0x4b5   :  { %397 = vrot.lane.b32.xlu0 %v2474_v8, %s2725_s0 }
 0x521   :  { %v396_v9 = vpop.permute.xlu1 %395 }
 0x522   :  { %v401_v11 = vmul.f32 %v2468_v55, %v396_v9 }
 0x527   :  { %v398_v10 = vpop.permute.xlu0 %397 }
 0x528   :  { %v402_v15 = vmul.f32 %v2470_v57, %v398_v10 }
 0x52a   :  { %v2863_v17 = vpack.c.bf16 %v402_v15, %v401_v11 }
 0x52c   :  { %405 = vrot.lane.b32.xlu1 %v2863_v17, %s2726_s5 }
 0x59e   :  { %v406_v16 = vpop.permute.xlu1 %405 }
 0x59f   :  { %2293 = vmatmul.mubr.msk.bf16.vlgmr.msra.gmra.mxu1 %vm210_vm1, %v406_v16 }
 0x5a0   :  { %521 = vmatpush1.bf16.msra.mxu1 %v2761_v4  ;;  %540 = vmatprep.mubr.bf16.mxu1 %v2724_v0 }
 0x5a1   :  { %522 = vmatprep.subr.bf16.mxu1 %v2768_v6 }
 0x5a4   :  { %523 = vmatpush1.bf16.msra.mxu1 %v2770_v7 }
 0x5a5   :  { %716 = vmatprep.subr.bf16.mxu1 %v2759_v2 }
 0x65f   :  { %v444_v18 = vpop.f32.mrf.mxu1 }
 0x660   :  { %v451_v19 = vadd.f32 %v444_v18, %v2820_v31 }
 0x661   :  { %v446_v20 = vpop.f32.mrf.mxu1 }
 0x662   :  { %2475 = vtanh.f32 %v451_v19  ;;  %v2294_v30 = vmul.f32 -1.442695, %v451_v19 }
 0x663   :  { %v447_v22 = vpop.f32.mrf.mxu1 }
 0x665   :  { %v448_v23 = vpop.f32.mrf.mxu1 }
 0x666   :  { %v452_v25 = vadd.f32 %v448_v23, %v2835_v46 }
 0x668   :  { %2477 = vtanh.f32 %v452_v25  ;;  %v2295_v32 = vmul.f32 -1.442695, %v452_v25 }
 0x669   :  { %2479 = vpow2.f32 %v2294_v30 }
 0x66a   :  { %2481 = vpow2.f32 %v2295_v32 }
 0x66f   :  { %v2476_v26 = vpop.eup %2475 }
 0x670   :  { %471 = vrot.lane.b32.xlu0 %v2476_v26, %s2725_s0 }
 0x675   :  { %v2478_v27 = vpop.eup %2477 }
 0x676   :  { %473 = vrot.lane.b32.xlu1 %v2478_v27, %s2725_s0  ;;  %v2480_v34 = vpop.eup %2479 }
 0x677   :  { %v459_v36 = vadd.f32 1.0, %v2480_v34  ;;  %v2482_v31 = vpop.eup %2481 }
 0x678   :  { %v460_v38 = vadd.f32 1.0, %v2482_v31 }
 0x679   :  { %2483 = vrcp.f32 %v459_v36 }
 0x67a   :  { %2485 = vrcp.f32 %v460_v38 }
 0x686   :  { %v2484_v40 = vpop.eup %2483 }
 0x687   :  { %v2486_v43 = vpop.eup %2485  ;;  %v467_v49 = vmul.f32 %v2484_v40, %v389_v62 }
 0x688   :  { %v468_v54 = vmul.f32 %v2486_v43, %v390_v3 }
 0x6e2   :  { %v472_v42 = vpop.permute.xlu0 %471 }
 0x6e3   :  { %v477_v46 = vmul.f32 %v2484_v40, %v472_v42 }
 0x6e5   :  { %481 = vrot.lane.b32.xlu0 %v477_v46, %s2726_s5 }
 0x6e8   :  { %v474_v45 = vpop.permute.xlu1 %473 }
 0x6e9   :  { %v478_v47 = vmul.f32 %v2486_v43, %v474_v45 }
 0x6eb   :  { %483 = vrot.lane.b32.xlu1 %v478_v47, %s2726_s5 }
 0x757   :  { %v482_v51 = vpop.permute.xlu0 %481 }
 0x758   :  { %v487_v53 = vadd.f32 %v482_v51, %v467_v49 }
 0x75a   :  { %2487 = vtanh.f32 %v487_v53 }
 0x75d   :  { %v484_v24 = vpop.permute.xlu1 %483 }
 0x75e   :  { %v488_v55 = vadd.f32 %v484_v24, %v468_v54 }
 0x760   :  { %2489 = vtanh.f32 %v488_v55 }
 0x767   :  { %v2488_v56 = vpop.eup %2487 }
 0x768   :  { %493 = vrot.lane.b32.xlu0 %v2488_v56, %s2725_s0 }
 0x76d   :  { %v2490_v50 = vpop.eup %2489 }
 0x76e   :  { %495 = vrot.lane.b32.xlu1 %v2490_v50, %s2725_s0 }
 0x7da   :  { %v494_v57 = vpop.permute.xlu0 %493 }
 0x7db   :  { %v499_v59 = vmul.f32 %v2484_v40, %v494_v57 }
 0x7e0   :  { %v496_v58 = vpop.permute.xlu1 %495 }
 0x7e1   :  { %v500_v60 = vmul.f32 %v2486_v43, %v496_v58 }
 0x7e3   :  { %v2881_v61 = vpack.c.bf16 %v500_v60, %v499_v59 }
 0x7e5   :  { %503 = vrot.lane.b32.xlu0 %v2881_v61, %s2726_s5 }
 0x857   :  { %v504_v62 = vpop.permute.xlu0 %503 }
 0x858   :  { %2296 = vmatmul.mubr.msk.bf16.vlgmr.msra.gmra.mxu1 %vm210_vm1, %v504_v62 }
 0x859   :  { %717 = vmatpush1.bf16.msra.mxu1 %v2761_v4  ;;  %736 = vmatprep.mubr.bf16.mxu1 %v2724_v0 }
 0x85a   :  { %718 = vmatprep.subr.bf16.mxu1 %v2768_v6 }
 0x85d   :  { %719 = vmatpush1.bf16.msra.mxu1 %v2770_v7 }
 0x85e   :  { %912 = vmatprep.subr.bf16.mxu1 %v2759_v2 }
 0x918   :  { %v542_v63 = vpop.f32.mrf.mxu1 }
 0x919   :  { %v549_v1 = vadd.f32 %v542_v63, %v2824_v35 }
 0x91a   :  { %v544_v3 = vpop.f32.mrf.mxu1 }
 0x91b   :  { %2491 = vtanh.f32 %v549_v1  ;;  %v2297_v15 = vmul.f32 -1.442695, %v549_v1 }
 0x91c   :  { %v545_v5 = vpop.f32.mrf.mxu1 }
 0x91e   :  { %v546_v8 = vpop.f32.mrf.mxu1 }
 0x91f   :  { %v550_v9 = vadd.f32 %v546_v8, %v2830_v41 }
 0x921   :  { %2493 = vtanh.f32 %v550_v9  ;;  %v2298_v16 = vmul.f32 -1.442695, %v550_v9 }
 0x922   :  { %2495 = vpow2.f32 %v2297_v15 }
 0x923   :  { %2497 = vpow2.f32 %v2298_v16 }
 0x928   :  { %v2492_v10 = vpop.eup %2491 }
 0x929   :  { %569 = vrot.lane.b32.xlu1 %v2492_v10, %s2725_s0 }
 0x92e   :  { %v2494_v11 = vpop.eup %2493 }
 0x92f   :  { %571 = vrot.lane.b32.xlu0 %v2494_v11, %s2725_s0  ;;  %v2496_v2 = vpop.eup %2495 }
 0x930   :  { %v557_v18 = vadd.f32 1.0, %v2496_v2  ;;  %v2498_v35 = vpop.eup %2497 }
 0x931   :  { %v558_v19 = vadd.f32 1.0, %v2498_v35 }
 0x932   :  { %2499 = vrcp.f32 %v557_v18 }
 0x933   :  { %2501 = vrcp.f32 %v558_v19 }
 0x93f   :  { %v2500_v20 = vpop.eup %2499 }
 0x940   :  { %v2502_v23 = vpop.eup %2501  ;;  %v565_v27 = vmul.f32 %v2500_v20, %v487_v53 }
 0x941   :  { %v566_v34 = vmul.f32 %v2502_v23, %v488_v55 }
 0x99b   :  { %v570_v22 = vpop.permute.xlu1 %569 }
 0x99c   :  { %v575_v41 = vmul.f32 %v2500_v20, %v570_v22 }
 0x99e   :  { %579 = vrot.lane.b32.xlu1 %v575_v41, %s2726_s5 }
 0x9a1   :  { %v572_v25 = vpop.permute.xlu0 %571 }
 0x9a2   :  { %v576_v26 = vmul.f32 %v2502_v23, %v572_v25 }
 0x9a4   :  { %581 = vrot.lane.b32.xlu0 %v576_v26, %s2726_s5 }
 0xa10   :  { %v580_v30 = vpop.permute.xlu1 %579 }
 0xa11   :  { %v585_v32 = vadd.f32 %v580_v30, %v565_v27 }
 0xa13   :  { %2503 = vtanh.f32 %v585_v32 }
 0xa16   :  { %v582_v36 = vpop.permute.xlu0 %581 }
 0xa17   :  { %v586_v31 = vadd.f32 %v582_v36, %v566_v34 }
 0xa19   :  { %2505 = vtanh.f32 %v586_v31 }
 0xa20   :  { %v2504_v38 = vpop.eup %2503 }
 0xa21   :  { %591 = vrot.lane.b32.xlu1 %v2504_v38, %s2725_s0 }
 0xa26   :  { %v2506_v40 = vpop.eup %2505 }
 0xa27   :  { %593 = vrot.lane.b32.xlu0 %v2506_v40, %s2725_s0 }
 0xa93   :  { %v592_v42 = vpop.permute.xlu1 %591 }
 0xa94   :  { %v597_v43 = vmul.f32 %v2500_v20, %v592_v42 }
 0xa99   :  { %v594_v46 = vpop.permute.xlu0 %593 }
 0xa9a   :  { %v598_v45 = vmul.f32 %v2502_v23, %v594_v46 }
 0xa9c   :  { %v2899_v47 = vpack.c.bf16 %v598_v45, %v597_v43 }
 0xa9e   :  { %601 = vrot.lane.b32.xlu1 %v2899_v47, %s2726_s5 }
 0xb10   :  { %v602_v49 = vpop.permute.xlu1 %601 }
 0xb11   :  { %2299 = vmatmul.mubr.msk.bf16.vlgmr.msra.gmra.mxu0 %vm210_vm1, %v602_v49 }
 0xb12   :  { %815 = vmatpush1.bf16.msra.mxu0 %v2761_v4  ;;  %834 = vmatprep.mubr.bf16.mxu0 %v2724_v0 }
 0xb13   :  { %816 = vmatprep.subr.bf16.mxu0 %v2768_v6 }
 0xb16   :  { %817 = vmatpush1.bf16.msra.mxu0 %v2770_v7 }
 0xbd1   :  { %v640_v51 = vpop.f32.mrf.mxu0 }
 0xbd2   :  { %v647_v53 = vadd.f32 %v640_v51, %v2828_v39 }
 0xbd3   :  { %v642_v54 = vpop.f32.mrf.mxu0 }
 0xbd4   :  { %2507 = vtanh.f32 %v647_v53  ;;  %v2300_v58 = vmul.f32 -1.442695, %v647_v53 }
 0xbd5   :  { %v643_v24 = vpop.f32.mrf.mxu0 }
 0xbd7   :  { %v644_v55 = vpop.f32.mrf.mxu0 }
 0xbd8   :  { %v648_v56 = vadd.f32 %v644_v55, %v2826_v37 }
 0xbda   :  { %2509 = vtanh.f32 %v648_v56  ;;  %v2301_v59 = vmul.f32 -1.442695, %v648_v56 }
 0xbdb   :  { %2511 = vpow2.f32 %v2300_v58 }
 0xbdc   :  { %2513 = vpow2.f32 %v2301_v59 }
 0xbe1   :  { %v2508_v50 = vpop.eup %2507 }
 0xbe2   :  { %667 = vrot.lane.b32.xlu0 %v2508_v50, %s2725_s0 }
 0xbe7   :  { %v2510_v57 = vpop.eup %2509 }
 0xbe8   :  { %669 = vrot.lane.b32.xlu1 %v2510_v57, %s2725_s0  ;;  %v2512_v60 = vpop.eup %2511 }
 0xbe9   :  { %v655_v62 = vadd.f32 1.0, %v2512_v60  ;;  %v2514_v39 = vpop.eup %2513 }
 0xbea   :  { %v656_v63 = vadd.f32 1.0, %v2514_v39 }
 0xbeb   :  { %2515 = vrcp.f32 %v655_v62 }
 0xbec   :  { %2517 = vrcp.f32 %v656_v63 }
 0xbf8   :  { %v2516_v1 = vpop.eup %2515 }
 0xbf9   :  { %v2518_v5 = vpop.eup %2517  ;;  %v663_v10 = vmul.f32 %v2516_v1, %v585_v32 }
 0xbfa   :  { %v664_v16 = vmul.f32 %v2518_v5, %v586_v31 }
 0xc54   :  { %v668_v3 = vpop.permute.xlu0 %667 }
 0xc55   :  { %v673_v37 = vmul.f32 %v2516_v1, %v668_v3 }
 0xc57   :  { %677 = vrot.lane.b32.xlu0 %v673_v37, %s2726_s5 }
 0xc5a   :  { %v670_v8 = vpop.permute.xlu1 %669 }
 0xc5b   :  { %v674_v9 = vmul.f32 %v2518_v5, %v670_v8 }
 0xc5d   :  { %679 = vrot.lane.b32.xlu1 %v674_v9, %s2726_s5 }
 0xcc9   :  { %v678_v11 = vpop.permute.xlu0 %677 }
 0xcca   :  { %v683_v15 = vadd.f32 %v678_v11, %v663_v10 }
 0xccc   :  { %2519 = vtanh.f32 %v683_v15 }
 0xccf   :  { %v680_v2 = vpop.permute.xlu1 %679 }
 0xcd0   :  { %v684_v18 = vadd.f32 %v680_v2, %v664_v16 }
 0xcd2   :  { %2521 = vtanh.f32 %v684_v18 }
 0xcd9   :  { %v2520_v35 = vpop.eup %2519 }
 0xcda   :  { %689 = vrot.lane.b32.xlu0 %v2520_v35, %s2725_s0 }
 0xcdf   :  { %v2522_v19 = vpop.eup %2521 }
 0xce0   :  { %691 = vrot.lane.b32.xlu1 %v2522_v19, %s2725_s0 }
 0xd4c   :  { %v690_v20 = vpop.permute.xlu0 %689 }
 0xd4d   :  { %v695_v41 = vmul.f32 %v2516_v1, %v690_v20 }
 0xd52   :  { %v692_v22 = vpop.permute.xlu1 %691 }
 0xd53   :  { %v696_v23 = vmul.f32 %v2518_v5, %v692_v22 }
 0xd55   :  { %v2916_v25 = vpack.c.bf16 %v696_v23, %v695_v41 }
 0xd57   :  { %699 = vrot.lane.b32.xlu0 %v2916_v25, %s2726_s5 }
 0xdc9   :  { %v700_v26 = vpop.permute.xlu0 %699 }
 0xdca   :  { %2302 = vmatmul.mubr.msk.bf16.vlgmr.msra.gmra.mxu1 %vm210_vm1, %v700_v26 }
 0xdcb   :  { %913 = vmatpush1.bf16.msra.mxu1 %v2761_v4  ;;  %932 = vmatprep.mubr.bf16.mxu1 %v2724_v0 }
 0xdcc   :  { %914 = vmatprep.subr.bf16.mxu1 %v2768_v6 }
 0xdcf   :  { %915 = vmatpush1.bf16.msra.mxu1 %v2770_v7 }
 0xe8a   :  { %v738_v27 = vpop.f32.mrf.mxu1 }
 0xe8b   :  { %v745_v30 = vadd.f32 %v738_v27, %v2832_v44 }
 0xe8c   :  { %v740_v32 = vpop.f32.mrf.mxu1 }
 0xe8d   :  { %2523 = vtanh.f32 %v745_v30  ;;  %v2303_v40 = vmul.f32 -1.442695, %v745_v30 }
 0xe8e   :  { %v741_v34 = vpop.f32.mrf.mxu1 }
 0xe90   :  { %v742_v36 = vpop.f32.mrf.mxu1 }
 0xe91   :  { %v746_v31 = vadd.f32 %v742_v36, %v2822_v33 }
 0xe93   :  { %2525 = vtanh.f32 %v746_v31  ;;  %v2304_v6 = vmul.f32 -1.442695, %v746_v31 }
 0xe94   :  { %2527 = vpow2.f32 %v2303_v40 }
 0xe95   :  { %2529 = vpow2.f32 %v2304_v6 }
 0xe9a   :  { %v2524_v38 = vpop.eup %2523 }
 0xe9b   :  { %765 = vrot.lane.b32.xlu1 %v2524_v38, %s2725_s0 }
 0xea0   :  { %v2526_v4 = vpop.eup %2525 }
 0xea1   :  { %767 = vrot.lane.b32.xlu0 %v2526_v4, %s2725_s0  ;;  %v2528_v7 = vpop.eup %2527 }
 0xea2   :  { %v753_v42 = vadd.f32 1.0, %v2528_v7  ;;  %v2530_v44 = vpop.eup %2529 }
 0xea3   :  { %v754_v46 = vadd.f32 1.0, %v2530_v44 }
 0xea4   :  { %2531 = vrcp.f32 %v753_v42 }
 0xea5   :  { %2533 = vrcp.f32 %v754_v46 }
 0xeb1   :  { %v2532_v43 = vpop.eup %2531 }
 0xeb2   :  { %v2534_v49 = vpop.eup %2533  ;;  %v761_v54 = vmul.f32 %v2532_v43, %v683_v15 }
 0xeb3   :  { %v762_v56 = vmul.f32 %v2534_v49, %v684_v18 }
 0xf0d   :  { %v766_v45 = vpop.permute.xlu1 %765 }
 0xf0e   :  { %v771_v33 = vmul.f32 %v2532_v43, %v766_v45 }
 0xf10   :  { %775 = vrot.lane.b32.xlu1 %v771_v33, %s2726_s5 }
 0xf13   :  { %v768_v51 = vpop.permute.xlu0 %767 }
 0xf14   :  { %v772_v53 = vmul.f32 %v2534_v49, %v768_v51 }
 0xf16   :  { %777 = vrot.lane.b32.xlu0 %v772_v53, %s2726_s5 }
 0xf82   :  { %v776_v24 = vpop.permute.xlu1 %775 }
 0xf83   :  { %v781_v55 = vadd.f32 %v776_v24, %v761_v54 }
 0xf85   :  { %2535 = vtanh.f32 %v781_v55 }
 0xf88   :  { %v778_v50 = vpop.permute.xlu0 %777 }
 0xf89   :  { %v782_v57 = vadd.f32 %v778_v50, %v762_v56 }
 0xf8b   :  { %2537 = vtanh.f32 %v782_v57 }
 0xf92   :  { %v2536_v58 = vpop.eup %2535 }
 0xf93   :  { %787 = vrot.lane.b32.xlu1 %v2536_v58, %s2725_s0 }
 0xf98   :  { %v2538_v59 = vpop.eup %2537 }
 0xf99   :  { %789 = vrot.lane.b32.xlu0 %v2538_v59, %s2725_s0 }
0x1005   :  { %v788_v60 = vpop.permute.xlu1 %787 }
0x1006   :  { %v793_v39 = vmul.f32 %v2532_v43, %v788_v60 }
0x100b   :  { %v790_v62 = vpop.permute.xlu0 %789 }
0x100c   :  { %v794_v63 = vmul.f32 %v2534_v49, %v790_v62 }
0x100e   :  { %v2933_v1 = vpack.c.bf16 %v794_v63, %v793_v39 }
0x1010   :  { %797 = vrot.lane.b32.xlu1 %v2933_v1, %s2726_s5 }
0x1082   :  { %v798_v3 = vpop.permute.xlu1 %797 }
0x1083   :  { %2305 = vmatmul.mubr.msk.bf16.vlgmr.msra.gmra.mxu0 %vm210_vm1, %v798_v3 }
0x1084   :  { %1090 = vmatprep.mubr.bf16.mxu0 %v2724_v0 }
0x1143   :  { %v836_v37 = vpop.f32.mrf.mxu0 }
0x1144   :  { %v843_v5 = vadd.f32 %v836_v37, %v2837_v48 }
0x1145   :  { %v838_v8 = vpop.f32.mrf.mxu0 }
0x1146   :  { %2539 = vtanh.f32 %v843_v5  ;;  %v2306_v2 = vmul.f32 -1.442695, %v843_v5 }
0x1147   :  { %v839_v9 = vpop.f32.mrf.mxu0 }
0x1148   :  { %v2419_v9 = vld [vmem:[#allocation2 + $0x40] ss:$8 sps:$4 sm:$0xff]  }
0x1149   :  { %v840_v10 = vpop.f32.mrf.mxu0 }
0x114a   :  { %v844_v11 = vadd.f32 %v840_v10, %v2818_v28  ;;  %v2421_v10 = vld [vmem:[#allocation2 + $0x44] ss:$8 sps:$4 sm:$0xff]  }
0x114b   :  { %1187 = vmatprep.subr.bf16.mxu1 %v2421_v10 }
0x114c   :  { %2541 = vtanh.f32 %v844_v11  ;;  %v2307_v18 = vmul.f32 -1.442695, %v844_v11 }
0x114d   :  { %2543 = vpow2.f32 %v2306_v2  ;;  %v2424_v2 = vld [vmem:[#allocation2 + $0x34] ss:$8 sps:$4 sm:$0xff]  }
0x114e   :  { %2545 = vpow2.f32 %v2307_v18  ;;  %v2422_v18 = vld [vmem:[#allocation2 + $0x30] ss:$8 sps:$4 sm:$0xff]  }
0x1153   :  { %v2540_v15 = vpop.eup %2539 }
0x1154   :  { %863 = vrot.lane.b32.xlu0 %v2540_v15, %s2725_s0 }
0x1159   :  { %v2542_v16 = vpop.eup %2541 }
0x115a   :  { %865 = vrot.lane.b32.xlu1 %v2542_v16, %s2725_s0  ;;  %v2544_v35 = vpop.eup %2543 }
0x115b   :  { %v851_v19 = vadd.f32 1.0, %v2544_v35  ;;  %v2546_v48 = vpop.eup %2545 }
0x115c   :  { %v852_v20 = vadd.f32 1.0, %v2546_v48  ;;  %v992_v48 = vrot.slane %v2863_v17, 4  ;;  %v2430_v17 = vld [vmem:[#allocation2 + $0x54] ss:$8 sps:$4 sm:$0xff]  }
0x115d   :  { %2547 = vrcp.f32 %v851_v19 }
0x115e   :  { %2549 = vrcp.f32 %v852_v20  ;;  %v993_v20 = vrot.slane %v2899_v47, 4  ;;  %v2428_v47 = vld [vmem:[#allocation2 + $0x50] ss:$8 sps:$4 sm:$0xff]  }
0x116a   :  { %v2548_v22 = vpop.eup %2547 }
0x116b   :  { %v2550_v23 = vpop.eup %2549  ;;  %v859_v30 = vmul.f32 %v2548_v22, %v781_v55 }
0x116c   :  { %v860_v36 = vmul.f32 %v2550_v23, %v782_v57 }
0x11c6   :  { %v864_v41 = vpop.permute.xlu0 %863 }
0x11c7   :  { %v869_v28 = vmul.f32 %v2548_v22, %v864_v41  ;;  %v994_v41 = vrot.slane %v2933_v1, 4 }
0x11c9   :  { %873 = vrot.lane.b32.xlu0 %v869_v28, %s2726_s5  ;;  %v1003_v28 = vsel %vm997_vm2, %v2881_v61, %v993_v20 }
0x11cc   :  { %v866_v26 = vpop.permute.xlu1 %865 }
0x11cd   :  { %v870_v27 = vmul.f32 %v2550_v23, %v866_v26  ;;  %v2427_v26 = vld [vmem:[#allocation2 + $0x64] ss:$8 sps:$4 sm:$0xff]  }
0x11ce   :  { %1070 = vmatprep.subr.bf16.mxu0 %v2427_v26 }
0x11cf   :  { %875 = vrot.lane.b32.xlu1 %v870_v27, %s2726_s5  ;;  %v2970_v27 = vld [vmem:[#allocation2 + $0x84] ss:$8 sps:$4 sm:$0xff]  }
0x123b   :  { %v874_v32 = vpop.permute.xlu0 %873 }
0x123c   :  { %v879_v34 = vadd.f32 %v874_v32, %v859_v30  ;;  %v1006_v30 = vsel %vm997_vm2, %v2916_v25, %v994_v41 }
0x123e   :  { %2551 = vtanh.f32 %v879_v34 }
0x1241   :  { %v876_v31 = vpop.permute.xlu1 %875 }
0x1242   :  { %v880_v38 = vadd.f32 %v876_v31, %v860_v36 }
0x1244   :  { %2553 = vtanh.f32 %v880_v38 }
0x124b   :  { %v2552_v4 = vpop.eup %2551 }
0x124c   :  { %885 = vrot.lane.b32.xlu0 %v2552_v4, %s2725_s0  ;;  %v2977_v4 = vld [vmem:[#allocation2 + $0x80] ss:$8 sps:$4 sm:$0xff]  }
0x1251   :  { %v2554_v40 = vpop.eup %2553 }
0x1252   :  { %887 = vrot.lane.b32.xlu1 %v2554_v40, %s2725_s0 }
0x12be   :  { %v886_v6 = vpop.permute.xlu0 %885 }
0x12bf   :  { %v891_v42 = vmul.f32 %v2548_v22, %v886_v6  ;;  %v1000_v22 = vsel %vm997_vm2, %v2846_v29, %v992_v48 }
0x12c4   :  { %v888_v7 = vpop.permute.xlu1 %887 }
0x12c5   :  { %v892_v44 = vmul.f32 %v2550_v23, %v888_v7  ;;  %v2425_v23 = vld [vmem:[#allocation2 + $0x60] ss:$8 sps:$4 sm:$0xff]  }
0x12c6   :  { %1071 = vmatpush1.bf16.msra.mxu0 %v2425_v23 }
0x12c7   :  { %v2947_v46 = vpack.c.bf16 %v892_v44, %v891_v42  ;;  %1072 = vmatprep.subr.bf16.mxu0 %v2430_v17  ;;  %v2986_v42 = vld [vmem:[#allocation2 + $0x74] ss:$8 sps:$4 sm:$0xff]   ;;  %v1011_v44 = vsel %vm997_vm2, %v994_v41, %v2916_v25  ;;  %v1013_v25 = vsel %vm997_vm2, %v992_v48, %v2846_v29 }
0x12c9   :  { %895 = vrot.lane.b32.xlu0 %v2947_v46, %s2726_s5 }
0x12ca   :  { %1073 = vmatpush1.bf16.msra.mxu0 %v2428_v47 }
0x12cb   :  { %1307 = vmatprep.subr.bf16.mxu0 %v2970_v27 }
0x133b   :  { %v896_v43 = vpop.permute.xlu0 %895 }
0x133c   :  { %2308 = vmatmul.mubr.msk.bf16.vlgmr.msra.gmra.mxu1 %vm210_vm1, %v896_v43 }
0x133d   :  { %1207 = vmatprep.mubr.bf16.mxu1 %v2724_v0  ;;  %1188 = vmatpush1.bf16.msra.mxu1 %v2419_v9 }
0x133e   :  { %1189 = vmatprep.subr.bf16.mxu1 %v2424_v2 }
0x1341   :  { %1190 = vmatpush1.bf16.msra.mxu1 %v2422_v18 }
0x1342   :  { %1405 = vmatprep.subr.bf16.mxu1 %v2970_v27 }
0x13fc   :  { %v934_v45 = vpop.f32.mrf.mxu1 }
0x13fd   :  { %v941_v33 = vadd.f32 %v934_v45, %v2839_v52  ;;  %v2994_v45 = vld [vmem:[#allocation2 + $0x70] ss:$8 sps:$4 sm:$0xff]  }
0x13fe   :  { %v936_v49 = vpop.f32.mrf.mxu1 }
0x13ff   :  { %2555 = vtanh.f32 %v941_v33  ;;  %v2309_v56 = vmul.f32 -1.442695, %v941_v33 }
0x1400   :  { %v937_v51 = vpop.f32.mrf.mxu1 }
0x1402   :  { %v938_v53 = vpop.f32.mrf.mxu1 }
0x1403   :  { %v942_v54 = vadd.f32 %v938_v53, %v2814_v21 }
0x1405   :  { %2557 = vtanh.f32 %v942_v54  ;;  %v2310_v50 = vmul.f32 -1.442695, %v942_v54 }
0x1406   :  { %2559 = vpow2.f32 %v2309_v56 }
0x1407   :  { %2561 = vpow2.f32 %v2310_v50 }
0x140c   :  { %v2556_v24 = vpop.eup %2555 }
0x140d   :  { %961 = vrot.lane.b32.xlu1 %v2556_v24, %s2725_s0 }
0x1412   :  { %v2558_v55 = vpop.eup %2557 }
0x1413   :  { %963 = vrot.lane.b32.xlu0 %v2558_v55, %s2725_s0  ;;  %v2560_v57 = vpop.eup %2559 }
0x1414   :  { %v949_v58 = vadd.f32 1.0, %v2560_v57  ;;  %v2562_v52 = vpop.eup %2561 }
0x1415   :  { %v950_v59 = vadd.f32 1.0, %v2562_v52 }
0x1416   :  { %2563 = vrcp.f32 %v949_v58 }
0x1417   :  { %2565 = vrcp.f32 %v950_v59  ;;  %v2273_v59 = vld [vmem:[%s3201_s3 + $0x1] ss:$4 sm:$0x3] }
0x1423   :  { %v2564_v60 = vpop.eup %2563 }
0x1424   :  { %v2566_v39 = vpop.eup %2565  ;;  %v957_v37 = vmul.f32 %v2564_v60, %v879_v34 }
0x1425   :  { %v958_v11 = vmul.f32 %v2566_v39, %v880_v38 }
0x147f   :  { %v962_v62 = vpop.permute.xlu1 %961 }
0x1480   :  { %v967_v21 = vmul.f32 %v2564_v60, %v962_v62 }
0x1482   :  { %971 = vrot.lane.b32.xlu1 %v967_v21, %s2726_s5 }
0x1485   :  { %v964_v63 = vpop.permute.xlu0 %963 }
0x1486   :  { %v968_v3 = vmul.f32 %v2566_v39, %v964_v63 }
0x1488   :  { %973 = vrot.lane.b32.xlu0 %v968_v3, %s2726_s5 }
0x14f4   :  { %v972_v5 = vpop.permute.xlu1 %971 }
0x14f5   :  { %v977_v8 = vadd.f32 %v972_v5, %v957_v37  ;;  %v1252_v37 = vrot.slane %v2273_v59, %v66_v13 }
0x14f7   :  { %2567 = vtanh.f32 %v977_v8 }
0x14fa   :  { %v974_v15 = vpop.permute.xlu0 %973 }
0x14fb   :  { %v978_v16 = vadd.f32 %v974_v15, %v958_v11 }
0x14fd   :  { %2569 = vtanh.f32 %v978_v16 }
0x1504   :  { %v2568_v35 = vpop.eup %2567 }
0x1505   :  { %983 = vrot.lane.b32.xlu1 %v2568_v35, %s2725_s0 }
0x150a   :  { %v2570_v19 = vpop.eup %2569 }
0x150b   :  { %985 = vrot.lane.b32.xlu0 %v2570_v19, %s2725_s0 }
0x150f   :  { %1135 = vrot.lane.b32.xlu0 %v1000_v22, %s2726_s5 }
0x1513   :  { %1137 = vrot.lane.b32.xlu0 %v1003_v28, %s2726_s5 }
0x1517   :  { %1139 = vrot.lane.b32.xlu0 %v1006_v30, %s2726_s5 }
0x1577   :  { %v984_v1 = vpop.permute.xlu1 %983 }
0x1578   :  { %v989_v34 = vmul.f32 %v2564_v60, %v984_v1  ;;  %v1256_v60 = vrot.slane %v2273_v59, %v70_v14 }
0x157d   :  { %v986_v32 = vpop.permute.xlu0 %985 }
0x157e   :  { %v990_v36 = vmul.f32 %v2566_v39, %v986_v32 }
0x1580   :  { %v991_v31 = vpack.c.bf16 %v990_v36, %v989_v34 }
0x1581   :  { %v1136_v38 = vpop.permute.xlu0 %1135 }
0x1582   :  { %v996_v40 = vrot.slane %v991_v31, 4  ;;  %2323 = vmatmul.mubr.msk.bf16.vlgmr.msra.gmra.mxu1 %vm210_vm1, %v1136_v38 }
0x1583   :  { %1217 = vmatprep.mubr.bf16.mxu1 %v2724_v0  ;;  %1406 = vmatpush1.bf16.msra.mxu1 %v2977_v4 }
0x1584   :  { %v1010_v6 = vsel %vm997_vm2, %v996_v40, %v2947_v46  ;;  %v1009_v7 = vsel %vm997_vm2, %v2947_v46, %v996_v40  ;;  %1407 = vmatprep.subr.bf16.mxu1 %v2986_v42  ;;  %v1012_v46 = vsel %vm997_vm2, %v993_v20, %v2881_v61 }
0x1585   :  { %1018 = vrot.lane.b32.xlu1 %v1010_v6, %s2726_s5  ;;  %1141 = vrot.lane.b32.xlu0 %v1009_v7, %s2726_s5  ;;  %v1138_v43 = vpop.permute.xlu0 %1137 }
0x1587   :  { %1408 = vmatpush1.bf16.msra.mxu1 %v2994_v45 }
0x1588   :  { %1601 = vmatprep.subr.bf16.mxu1 %v2970_v27 }
0x1589   :  { %1020 = vrot.lane.b32.xlu1 %v1011_v44, %s2726_s5  ;;  %v1140_v33 = vpop.permute.xlu0 %1139 }
0x158a   :  { %2324 = vmatmul.mubr.msk.bf16.gmra.mxu1 %vm210_vm1, %v1138_v43 }
0x158b   :  { %1227 = vmatprep.mubr.bf16.mxu1 %v2724_v0 }
0x158d   :  { %1022 = vrot.lane.b32.xlu1 %v1012_v46, %s2726_s5 }
0x1591   :  { %1024 = vrot.lane.b32.xlu1 %v1013_v25, %s2726_s5 }
0x1592   :  { %2325 = vmatmul.mubr.msk.bf16.gmra.mxu1 %vm210_vm1, %v1140_v33 }
0x1593   :  { %1237 = vmatprep.mubr.bf16.mxu1 %v2724_v0 }
0x15f7   :  { %v1019_v49 = vpop.permute.xlu1 %1018  ;;  %v1142_v51 = vpop.permute.xlu0 %1141 }
0x15f8   :  { %2315 = vmatmul.mubr.msk.bf16.vlgmr.msra.gmra.mxu0 %vm210_vm1, %v1019_v49  ;;  %2326 = vmatmul.mubr.msk.bf16.gmra.mxu1 %vm210_vm1, %v1142_v51 }
0x15f9   :  { %1308 = vmatpush1.bf16.msra.mxu0 %v2977_v4  ;;  %1100 = vmatprep.mubr.bf16.mxu0 %v2724_v0 }
0x15fa   :  { %1309 = vmatprep.subr.bf16.mxu0 %v2986_v42  ;;  %1425 = vmatprep.mubr.bf16.mxu1 %v2724_v0 }
0x15fb   :  { %v1021_v29 = vpop.permute.xlu1 %1020 }
0x15fd   :  { %1310 = vmatpush1.bf16.msra.mxu0 %v2994_v45 }
0x15fe   :  { %1503 = vmatprep.subr.bf16.mxu0 %v2970_v27 }
0x15ff   :  { %v1023_v61 = vpop.permute.xlu1 %1022 }
0x1600   :  { %2316 = vmatmul.mubr.msk.bf16.gmra.mxu0 %vm210_vm1, %v1021_v29 }
0x1601   :  { %1110 = vmatprep.mubr.bf16.mxu0 %v2724_v0 }
0x1603   :  { %v1025_v53 = vpop.permute.xlu1 %1024 }
0x1608   :  { %2317 = vmatmul.mubr.msk.bf16.gmra.mxu0 %vm210_vm1, %v1023_v61 }
0x1609   :  { %1120 = vmatprep.mubr.bf16.mxu0 %v2724_v0 }
0x1610   :  { %2318 = vmatmul.mubr.msk.bf16.gmra.mxu0 %vm210_vm1, %v1025_v53 }
0x1611   :  { %1327 = vmatprep.mubr.bf16.mxu0 %v2724_v0 }
0x1618   :  { %1328 = vmatmul.mubr.bf16.vlgmr.msra.gmra.mxu0 %v2724_v0 }
0x1619   :  { %1504 = vmatpush1.bf16.msra.mxu0 %v2977_v4  ;;  %1523 = vmatprep.mubr.bf16.mxu0 %v2724_v0 }
0x161a   :  { %1505 = vmatprep.subr.bf16.mxu0 %v2986_v42 }
0x161d   :  { %1506 = vmatpush1.bf16.msra.mxu0 %v2994_v45 }
0x161e   :  { %1699 = vmatprep.subr.bf16.mxu0 %v2970_v27 }
0x1642   :  { %v1209_v54 = vpop.f32.mrf.mxu1 }
0x1644   :  { %v1211_v24 = vpop.f32.mrf.mxu1 }
0x1646   :  { %v1213_v55 = vpop.f32.mrf.mxu1 }
0x1648   :  { %v1215_v56 = vpop.f32.mrf.mxu1 }
0x164a   :  { %v1219_v50 = vpop.f32.mrf.mxu1 }
0x164c   :  { %v1221_v57 = vpop.f32.mrf.mxu1 }
0x164e   :  { %v1223_v58 = vpop.f32.mrf.mxu1 }
0x1650   :  { %v1225_v62 = vpop.f32.mrf.mxu1 }
0x1652   :  { %v1229_v8 = vpop.f32.mrf.mxu1 }
0x1654   :  { %v1231_v14 = vpop.f32.mrf.mxu1 }
0x1656   :  { %v1233_v13 = vpop.f32.mrf.mxu1 }
0x1658   :  { %v1235_v47 = vpop.f32.mrf.mxu1 }
0x16b8   :  { %v1092_v52 = vpop.f32.mrf.mxu0  ;;  %v1239_v34 = vpop.f32.mrf.mxu1 }
0x16b9   :  { %v1210_v49 = vadd.f32 %v1209_v54, %v1092_v52 }
0x16ba   :  { %v1094_v21 = vpop.f32.mrf.mxu0  ;;  %v1241_v44 = vpop.f32.mrf.mxu1 }
0x16bb   :  { %v1212_v39 = vadd.f32 %v1211_v24, %v1094_v21 }
0x16bc   :  { %v1096_v63 = vpop.f32.mrf.mxu0  ;;  %v1243_v61 = vpop.f32.mrf.mxu1 }
0x16bd   :  { %v1214_v3 = vadd.f32 %v1213_v55, %v1096_v63  ;;  %v3035_v5 = vadd.f32 %v1256_v60, %v1212_v39 }
0x16be   :  { %v1098_v9 = vpop.f32.mrf.mxu0 }
0x16bf   :  { %v1216_v10 = vadd.f32 %v1215_v56, %v1098_v9  ;;  %v3037_v11 = vadd.f32 %v1252_v37, %v1214_v3 }
0x16c0   :  { %v1102_v15 = vpop.f32.mrf.mxu0 }
0x16c1   :  { %v1220_v16 = vadd.f32 %v1219_v50, %v1102_v15  ;;  %v3039_v2 = vadd.f32 %v1256_v60, %v1216_v10  ;;  %v1259_v50 = vadd.f32 %v1252_v37, %v1210_v49 }
0x16c2   :  { %v1104_v18 = vpop.f32.mrf.mxu0 }
0x16c3   :  { %v1222_v35 = vadd.f32 %v1221_v57, %v1104_v18  ;;  %v3041_v19 = vadd.f32 %v1252_v37, %v1220_v16 }
0x16c4   :  { %v1106_v48 = vpop.f32.mrf.mxu0 }
0x16c5   :  { %v1224_v20 = vadd.f32 %v1223_v58, %v1106_v48  ;;  %v3043_v12 = vadd.f32 %v1256_v60, %v1222_v35  ;;  %v1245_v58 = vpop.f32.mrf.mxu1 }
0x16c6   :  { %v1108_v22 = vpop.f32.mrf.mxu0 }
0x16c7   :  { %v1226_v41 = vadd.f32 %v1225_v62, %v1108_v22  ;;  %v3045_v28 = vadd.f32 %v1252_v37, %v1224_v20 }
0x16c8   :  { %v1112_v23 = vpop.f32.mrf.mxu0 }
0x16c9   :  { %v1230_v26 = vadd.f32 %v1229_v8, %v1112_v23  ;;  %v3047_v17 = vadd.f32 %v1256_v60, %v1226_v41 }
0x16ca   :  { %v1114_v30 = vpop.f32.mrf.mxu0 }
0x16cb   :  { %v1232_v1 = vadd.f32 %v1231_v14, %v1114_v30  ;;  %v3049_v32 = vadd.f32 %v1252_v37, %v1230_v26 }
0x16cc   :  { %v1116_v36 = vpop.f32.mrf.mxu0 }
0x16cd   :  { %v1234_v31 = vadd.f32 %v1233_v13, %v1116_v36  ;;  %v3051_v38 = vadd.f32 %v1256_v60, %v1232_v1 }
0x16ce   :  { %v1118_v40 = vpop.f32.mrf.mxu0 }
0x16cf   :  { %v1236_v6 = vadd.f32 %v1235_v47, %v1118_v40  ;;  %v3053_v7 = vadd.f32 %v1252_v37, %v1234_v31 }
0x16d0   :  { %v1122_v43 = vpop.f32.mrf.mxu0 }
0x16d1   :  { %v1240_v46 = vadd.f32 %v1239_v34, %v1122_v43  ;;  %v3055_v25 = vadd.f32 %v1256_v60, %v1236_v6 }
0x16d2   :  { %v1124_v33 = vpop.f32.mrf.mxu0 }
0x16d3   :  { %v1242_v51 = vadd.f32 %v1241_v44, %v1124_v33  ;;  %v3057_v29 = vadd.f32 %v1252_v37, %v1240_v46 }
0x16d4   :  { %v1126_v53 = vpop.f32.mrf.mxu0 }
0x16d5   :  { %v1244_v24 = vadd.f32 %v1243_v61, %v1126_v53  ;;  %v3059_v55 = vadd.f32 %v1256_v60, %v1242_v51 }
0x16d6   :  { %v1128_v56 = vpop.f32.mrf.mxu0 }
0x16d7   :  { %v3061_v57 = vadd.f32 %v1252_v37, %v1244_v24  ;;  %v1246_v62 = vadd.f32 %v1245_v58, %v1128_v56 }
0x16d8   :  { %v1329_v59 = vpop.f32.mrf.mxu0 }
0x16d9   :  { %v1336_v21 = vadd.f32 %v1329_v59, %v1259_v50  ;;  %v1274_v54 = vadd.f32 %v1256_v60, %v1246_v62 }
0x16da   :  { %v1331_v39 = vpop.f32.mrf.mxu0 }
0x16db   :  { %2571 = vtanh.f32 %v1336_v21  ;;  %v2331_v10 = vmul.f32 -1.442695, %v1336_v21 }
0x16dc   :  { %v1332_v63 = vpop.f32.mrf.mxu0 }
0x16de   :  { %v1333_v52 = vpop.f32.mrf.mxu0 }
0x16df   :  { %v1337_v3 = vadd.f32 %v1333_v52, %v1274_v54 }
0x16e1   :  { %2573 = vtanh.f32 %v1337_v3  ;;  %v2332_v37 = vmul.f32 -1.442695, %v1337_v3 }
0x16e2   :  { %2575 = vpow2.f32 %v2331_v10 }
0x16e3   :  { %2577 = vpow2.f32 %v2332_v37 }
0x16e8   :  { %v2572_v8 = vpop.eup %2571 }
0x16e9   :  { %1356 = vrot.lane.b32.xlu1 %v2572_v8, %s2725_s0 }
0x16ee   :  { %v2574_v9 = vpop.eup %2573 }
0x16ef   :  { %1358 = vrot.lane.b32.xlu0 %v2574_v9, %s2725_s0  ;;  %v2576_v15 = vpop.eup %2575 }
0x16f0   :  { %v1344_v16 = vadd.f32 1.0, %v2576_v15  ;;  %v2578_v14 = vpop.eup %2577 }
0x16f1   :  { %v1345_v18 = vadd.f32 1.0, %v2578_v14 }
0x16f2   :  { %2579 = vrcp.f32 %v1344_v16 }
0x16f3   :  { %2581 = vrcp.f32 %v1345_v18 }
0x16ff   :  { %v2580_v60 = vpop.eup %2579 }
0x1700   :  { %v2582_v20 = vpop.eup %2581  ;;  %v1352_v41 = vmul.f32 0.0, %v2580_v60 }
0x1701   :  { %v1353_v47 = vmul.f32 0.0, %v2582_v20 }
0x175b   :  { %v1357_v35 = vpop.permute.xlu1 %1356 }
0x175c   :  { %v1362_v48 = vmul.f32 %v2580_v60, %v1357_v35 }
0x175e   :  { %1366 = vrot.lane.b32.xlu1 %v1362_v48, %s2726_s5 }
0x1761   :  { %v1359_v13 = vpop.permute.xlu0 %1358 }
0x1762   :  { %v1363_v22 = vmul.f32 %v2582_v20, %v1359_v13 }
0x1764   :  { %1368 = vrot.lane.b32.xlu0 %v1363_v22, %s2726_s5 }
0x17d0   :  { %v1367_v23 = vpop.permute.xlu1 %1366 }
0x17d1   :  { %v1372_v26 = vadd.f32 %v1367_v23, %v1352_v41 }
0x17d3   :  { %2583 = vtanh.f32 %v1372_v26 }
0x17d6   :  { %v1369_v30 = vpop.permute.xlu0 %1368 }
0x17d7   :  { %v1373_v1 = vadd.f32 %v1369_v30, %v1353_v47 }
0x17d9   :  { %2585 = vtanh.f32 %v1373_v1 }
0x17e0   :  { %v2584_v34 = vpop.eup %2583 }
0x17e1   :  { %1378 = vrot.lane.b32.xlu1 %v2584_v34, %s2725_s0 }
0x17e6   :  { %v2586_v36 = vpop.eup %2585 }
0x17e7   :  { %1380 = vrot.lane.b32.xlu0 %v2586_v36, %s2725_s0 }
0x1853   :  { %v1379_v31 = vpop.permute.xlu1 %1378 }
0x1854   :  { %v1384_v6 = vmul.f32 %v2580_v60, %v1379_v31 }
0x1859   :  { %v1381_v40 = vpop.permute.xlu0 %1380 }
0x185a   :  { %v1385_v44 = vmul.f32 %v2582_v20, %v1381_v40 }
0x185c   :  { %v1386_v43 = vpack.c.bf16 %v1385_v44, %v1384_v6 }
0x185e   :  { %1388 = vrot.lane.b32.xlu1 %v1386_v43, %s2726_s5 }
0x18d0   :  { %v1389_v46 = vpop.permute.xlu1 %1388 }
0x18d1   :  { %2333 = vmatmul.mubr.msk.bf16.vlgmr.msra.gmra.mxu1 %vm210_vm1, %v1389_v46 }
0x18d2   :  { %1602 = vmatpush1.bf16.msra.mxu1 %v2977_v4  ;;  %1621 = vmatprep.mubr.bf16.mxu1 %v2724_v0 }
0x18d3   :  { %1603 = vmatprep.subr.bf16.mxu1 %v2986_v42 }
0x18d6   :  { %1604 = vmatpush1.bf16.msra.mxu1 %v2994_v45 }
0x18d7   :  { %1797 = vmatprep.subr.bf16.mxu1 %v2970_v27 }
0x1991   :  { %v1427_v33 = vpop.f32.mrf.mxu1 }
0x1992   :  { %v1434_v49 = vadd.f32 %v1427_v33, %v3037_v11 }
0x1993   :  { %v1429_v51 = vpop.f32.mrf.mxu1 }
0x1994   :  { %2587 = vtanh.f32 %v1434_v49  ;;  %v2334_v58 = vmul.f32 -1.442695, %v1434_v49 }
0x1995   :  { %v1430_v61 = vpop.f32.mrf.mxu1 }
0x1997   :  { %v1431_v53 = vpop.f32.mrf.mxu1 }
0x1998   :  { %v1435_v24 = vadd.f32 %v1431_v53, %v3059_v55 }
0x199a   :  { %2589 = vtanh.f32 %v1435_v24  ;;  %v2335_v59 = vmul.f32 -1.442695, %v1435_v24 }
0x199b   :  { %2591 = vpow2.f32 %v2334_v58 }
0x199c   :  { %2593 = vpow2.f32 %v2335_v59 }
0x19a1   :  { %v2588_v56 = vpop.eup %2587 }
0x19a2   :  { %1454 = vrot.lane.b32.xlu0 %v2588_v56, %s2725_s0 }
0x19a7   :  { %v2590_v50 = vpop.eup %2589 }
0x19a8   :  { %1456 = vrot.lane.b32.xlu1 %v2590_v50, %s2725_s0  ;;  %v2592_v62 = vpop.eup %2591 }
0x19a9   :  { %v1442_v21 = vadd.f32 1.0, %v2592_v62  ;;  %v2594_v11 = vpop.eup %2593 }
0x19aa   :  { %v1443_v39 = vadd.f32 1.0, %v2594_v11 }
0x19ab   :  { %2595 = vrcp.f32 %v1442_v21 }
0x19ac   :  { %2597 = vrcp.f32 %v1443_v39 }
0x19b8   :  { %v2596_v63 = vpop.eup %2595 }
0x19b9   :  { %v2598_v52 = vpop.eup %2597  ;;  %v1450_v9 = vmul.f32 %v2596_v63, %v1372_v26 }
0x19ba   :  { %v1451_v15 = vmul.f32 %v2598_v52, %v1373_v1 }
0x1a14   :  { %v1455_v54 = vpop.permute.xlu0 %1454 }
0x1a15   :  { %v1460_v55 = vmul.f32 %v2596_v63, %v1455_v54 }
0x1a17   :  { %1464 = vrot.lane.b32.xlu0 %v1460_v55, %s2726_s5 }
0x1a1a   :  { %v1457_v3 = vpop.permute.xlu1 %1456 }
0x1a1b   :  { %v1461_v8 = vmul.f32 %v2598_v52, %v1457_v3 }
0x1a1d   :  { %1466 = vrot.lane.b32.xlu1 %v1461_v8, %s2726_s5 }
0x1a89   :  { %v1465_v10 = vpop.permute.xlu0 %1464 }
0x1a8a   :  { %v1470_v37 = vadd.f32 %v1465_v10, %v1450_v9 }
0x1a8c   :  { %2599 = vtanh.f32 %v1470_v37 }
0x1a8f   :  { %v1467_v16 = vpop.permute.xlu1 %1466 }
0x1a90   :  { %v1471_v14 = vadd.f32 %v1467_v16, %v1451_v15 }
0x1a92   :  { %2601 = vtanh.f32 %v1471_v14 }
0x1a99   :  { %v2600_v18 = vpop.eup %2599 }
0x1a9a   :  { %1476 = vrot.lane.b32.xlu0 %v2600_v18, %s2725_s0 }
0x1a9f   :  { %v2602_v60 = vpop.eup %2601 }
0x1aa0   :  { %1478 = vrot.lane.b32.xlu1 %v2602_v60, %s2725_s0 }
0x1b0c   :  { %v1477_v35 = vpop.permute.xlu0 %1476 }
0x1b0d   :  { %v1482_v20 = vmul.f32 %v2596_v63, %v1477_v35 }
0x1b12   :  { %v1479_v48 = vpop.permute.xlu1 %1478 }
0x1b13   :  { %v1483_v13 = vmul.f32 %v2598_v52, %v1479_v48 }
0x1b15   :  { %v1484_v22 = vpack.c.bf16 %v1483_v13, %v1482_v20 }
0x1b17   :  { %1486 = vrot.lane.b32.xlu0 %v1484_v22, %s2726_s5 }
0x1b89   :  { %v1487_v41 = vpop.permute.xlu0 %1486 }
0x1b8a   :  { %2336 = vmatmul.mubr.msk.bf16.vlgmr.msra.gmra.mxu0 %vm210_vm1, %v1487_v41 }
0x1b8b   :  { %1700 = vmatpush1.bf16.msra.mxu0 %v2977_v4  ;;  %1719 = vmatprep.mubr.bf16.mxu0 %v2724_v0 }
0x1b8c   :  { %1701 = vmatprep.subr.bf16.mxu0 %v2986_v42 }
0x1b8f   :  { %1702 = vmatpush1.bf16.msra.mxu0 %v2994_v45 }
0x1b90   :  { %1895 = vmatprep.subr.bf16.mxu0 %v2970_v27 }
0x1c4a   :  { %v1525_v23 = vpop.f32.mrf.mxu0 }
0x1c4b   :  { %v1532_v26 = vadd.f32 %v1525_v23, %v3041_v19 }
0x1c4c   :  { %v1527_v47 = vpop.f32.mrf.mxu0 }
0x1c4d   :  { %2603 = vtanh.f32 %v1532_v26  ;;  %v2337_v40 = vmul.f32 -1.442695, %v1532_v26 }
0x1c4e   :  { %v1528_v30 = vpop.f32.mrf.mxu0 }
0x1c50   :  { %v1529_v1 = vpop.f32.mrf.mxu0 }
0x1c51   :  { %v1533_v34 = vadd.f32 %v1529_v1, %v3055_v25 }
0x1c53   :  { %2605 = vtanh.f32 %v1533_v34  ;;  %v2338_v6 = vmul.f32 -1.442695, %v1533_v34 }
0x1c54   :  { %2607 = vpow2.f32 %v2337_v40 }
0x1c55   :  { %2609 = vpow2.f32 %v2338_v6 }
0x1c5a   :  { %v2604_v36 = vpop.eup %2603 }
0x1c5b   :  { %1552 = vrot.lane.b32.xlu1 %v2604_v36, %s2725_s0 }
0x1c60   :  { %v2606_v31 = vpop.eup %2605 }
0x1c61   :  { %1554 = vrot.lane.b32.xlu0 %v2606_v31, %s2725_s0  ;;  %v2608_v44 = vpop.eup %2607 }
0x1c62   :  { %v1540_v43 = vadd.f32 1.0, %v2608_v44  ;;  %v2610_v19 = vpop.eup %2609 }
0x1c63   :  { %v1541_v46 = vadd.f32 1.0, %v2610_v19 }
0x1c64   :  { %2611 = vrcp.f32 %v1540_v43 }
0x1c65   :  { %2613 = vrcp.f32 %v1541_v46 }
0x1c71   :  { %v2612_v33 = vpop.eup %2611 }
0x1c72   :  { %v2614_v51 = vpop.eup %2613  ;;  %v1548_v24 = vmul.f32 %v2612_v33, %v1470_v37 }
0x1c73   :  { %v1549_v58 = vmul.f32 %v2614_v51, %v1471_v14 }
0x1ccd   :  { %v1553_v49 = vpop.permute.xlu1 %1552 }
0x1cce   :  { %v1558_v25 = vmul.f32 %v2612_v33, %v1553_v49 }
0x1cd0   :  { %1562 = vrot.lane.b32.xlu1 %v1558_v25, %s2726_s5 }
0x1cd3   :  { %v1555_v61 = vpop.permute.xlu0 %1554 }
0x1cd4   :  { %v1559_v53 = vmul.f32 %v2614_v51, %v1555_v61 }
0x1cd6   :  { %1564 = vrot.lane.b32.xlu0 %v1559_v53, %s2726_s5 }
0x1d42   :  { %v1563_v56 = vpop.permute.xlu1 %1562 }
0x1d43   :  { %v1568_v50 = vadd.f32 %v1563_v56, %v1548_v24 }
0x1d45   :  { %2615 = vtanh.f32 %v1568_v50 }
0x1d48   :  { %v1565_v59 = vpop.permute.xlu0 %1564 }
0x1d49   :  { %v1569_v62 = vadd.f32 %v1565_v59, %v1549_v58 }
0x1d4b   :  { %2617 = vtanh.f32 %v1569_v62 }
0x1d52   :  { %v2616_v21 = vpop.eup %2615 }
0x1d53   :  { %1574 = vrot.lane.b32.xlu1 %v2616_v21, %s2725_s0 }
0x1d58   :  { %v2618_v11 = vpop.eup %2617 }
0x1d59   :  { %1576 = vrot.lane.b32.xlu0 %v2618_v11, %s2725_s0 }
0x1dc5   :  { %v1575_v39 = vpop.permute.xlu1 %1574 }
0x1dc6   :  { %v1580_v54 = vmul.f32 %v2612_v33, %v1575_v39 }
0x1dcb   :  { %v1577_v63 = vpop.permute.xlu0 %1576 }
0x1dcc   :  { %v1581_v55 = vmul.f32 %v2614_v51, %v1577_v63 }
0x1dce   :  { %v1582_v52 = vpack.c.bf16 %v1581_v55, %v1580_v54 }
0x1dd0   :  { %1584 = vrot.lane.b32.xlu1 %v1582_v52, %s2726_s5 }
0x1e42   :  { %v1585_v3 = vpop.permute.xlu1 %1584 }
0x1e43   :  { %2339 = vmatmul.mubr.msk.bf16.vlgmr.msra.gmra.mxu1 %vm210_vm1, %v1585_v3 }
0x1e44   :  { %1798 = vmatpush1.bf16.msra.mxu1 %v2977_v4  ;;  %1817 = vmatprep.mubr.bf16.mxu1 %v2724_v0 }
0x1e45   :  { %1799 = vmatprep.subr.bf16.mxu1 %v2986_v42 }
0x1e48   :  { %1800 = vmatpush1.bf16.msra.mxu1 %v2994_v45 }
0x1e49   :  { %1993 = vmatprep.subr.bf16.mxu1 %v2970_v27 }
0x1f03   :  { %v1623_v8 = vpop.f32.mrf.mxu1 }
0x1f04   :  { %v1630_v9 = vadd.f32 %v1623_v8, %v3045_v28 }
0x1f05   :  { %v1625_v10 = vpop.f32.mrf.mxu1 }
0x1f06   :  { %2619 = vtanh.f32 %v1630_v9  ;;  %v2340_v60 = vmul.f32 -1.442695, %v1630_v9 }
0x1f07   :  { %v1626_v37 = vpop.f32.mrf.mxu1 }
0x1f09   :  { %v1627_v15 = vpop.f32.mrf.mxu1 }
0x1f0a   :  { %v1631_v16 = vadd.f32 %v1627_v15, %v3051_v38 }
0x1f0c   :  { %2621 = vtanh.f32 %v1631_v16  ;;  %v2341_v35 = vmul.f32 -1.442695, %v1631_v16 }
0x1f0d   :  { %2623 = vpow2.f32 %v2340_v60 }
0x1f0e   :  { %2625 = vpow2.f32 %v2341_v35 }
0x1f13   :  { %v2620_v14 = vpop.eup %2619 }
0x1f14   :  { %1650 = vrot.lane.b32.xlu0 %v2620_v14, %s2725_s0 }
0x1f19   :  { %v2622_v18 = vpop.eup %2621 }
0x1f1a   :  { %1652 = vrot.lane.b32.xlu1 %v2622_v18, %s2725_s0  ;;  %v2624_v27 = vpop.eup %2623 }
0x1f1b   :  { %v1638_v48 = vadd.f32 1.0, %v2624_v27  ;;  %v2626_v28 = vpop.eup %2625 }
0x1f1c   :  { %v1639_v20 = vadd.f32 1.0, %v2626_v28 }
0x1f1d   :  { %2627 = vrcp.f32 %v1638_v48 }
0x1f1e   :  { %2629 = vrcp.f32 %v1639_v20 }
0x1f2a   :  { %v2628_v13 = vpop.eup %2627 }
0x1f2b   :  { %v2630_v41 = vpop.eup %2629  ;;  %v1646_v47 = vmul.f32 %v2628_v13, %v1568_v50 }
0x1f2c   :  { %v1647_v34 = vmul.f32 %v2630_v41, %v1569_v62 }
0x1f86   :  { %v1651_v22 = vpop.permute.xlu0 %1650 }
0x1f87   :  { %v1656_v38 = vmul.f32 %v2628_v13, %v1651_v22 }
0x1f89   :  { %1660 = vrot.lane.b32.xlu0 %v1656_v38, %s2726_s5 }
0x1f8c   :  { %v1653_v23 = vpop.permute.xlu1 %1652 }
0x1f8d   :  { %v1657_v26 = vmul.f32 %v2630_v41, %v1653_v23 }
0x1f8f   :  { %1662 = vrot.lane.b32.xlu1 %v1657_v26, %s2726_s5 }
0x1ffb   :  { %v1661_v30 = vpop.permute.xlu0 %1660 }
0x1ffc   :  { %v1666_v1 = vadd.f32 %v1661_v30, %v1646_v47 }
0x1ffe   :  { %2631 = vtanh.f32 %v1666_v1 }
0x2001   :  { %v1663_v36 = vpop.permute.xlu1 %1662 }
0x2002   :  { %v1667_v31 = vadd.f32 %v1663_v36, %v1647_v34 }
0x2004   :  { %2633 = vtanh.f32 %v1667_v31 }
0x200b   :  { %v2632_v40 = vpop.eup %2631 }
0x200c   :  { %1672 = vrot.lane.b32.xlu0 %v2632_v40, %s2725_s0 }
0x2011   :  { %v2634_v6 = vpop.eup %2633 }
0x2012   :  { %1674 = vrot.lane.b32.xlu1 %v2634_v6, %s2725_s0 }
0x207e   :  { %v1673_v44 = vpop.permute.xlu0 %1672 }
0x207f   :  { %v1678_v19 = vmul.f32 %v2628_v13, %v1673_v44 }
0x2084   :  { %v1675_v43 = vpop.permute.xlu1 %1674 }
0x2085   :  { %v1679_v46 = vmul.f32 %v2630_v41, %v1675_v43 }
0x2087   :  { %v1680_v33 = vpack.c.bf16 %v1679_v46, %v1678_v19 }
0x2089   :  { %1682 = vrot.lane.b32.xlu0 %v1680_v33, %s2726_s5 }
0x20fb   :  { %v1683_v49 = vpop.permute.xlu0 %1682 }
0x20fc   :  { %2342 = vmatmul.mubr.msk.bf16.vlgmr.msra.gmra.mxu0 %vm210_vm1, %v1683_v49 }
0x20fd   :  { %1896 = vmatpush1.bf16.msra.mxu0 %v2977_v4  ;;  %1915 = vmatprep.mubr.bf16.mxu0 %v2724_v0 }
0x20fe   :  { %1897 = vmatprep.subr.bf16.mxu0 %v2986_v42 }
0x2101   :  { %1898 = vmatpush1.bf16.msra.mxu0 %v2994_v45 }
0x21bc   :  { %v1721_v25 = vpop.f32.mrf.mxu0 }
0x21bd   :  { %v1728_v51 = vadd.f32 %v1721_v25, %v3049_v32 }
0x21be   :  { %v1723_v61 = vpop.f32.mrf.mxu0 }
0x21bf   :  { %2635 = vtanh.f32 %v1728_v51  ;;  %v2343_v59 = vmul.f32 -1.442695, %v1728_v51 }
0x21c0   :  { %v1724_v53 = vpop.f32.mrf.mxu0 }
0x21c2   :  { %v1725_v24 = vpop.f32.mrf.mxu0 }
0x21c3   :  { %v1729_v56 = vadd.f32 %v1725_v24, %v3047_v17 }
0x21c5   :  { %2637 = vtanh.f32 %v1729_v56  ;;  %v2344_v62 = vmul.f32 -1.442695, %v1729_v56 }
0x21c6   :  { %2639 = vpow2.f32 %v2343_v59 }
0x21c7   :  { %2641 = vpow2.f32 %v2344_v62 }
0x21cc   :  { %v2636_v50 = vpop.eup %2635 }
0x21cd   :  { %1748 = vrot.lane.b32.xlu1 %v2636_v50, %s2725_s0 }
0x21d2   :  { %v2638_v58 = vpop.eup %2637 }
0x21d3   :  { %1750 = vrot.lane.b32.xlu0 %v2638_v58, %s2725_s0  ;;  %v2640_v21 = vpop.eup %2639 }
0x21d4   :  { %v1736_v11 = vadd.f32 1.0, %v2640_v21  ;;  %v2642_v32 = vpop.eup %2641 }
0x21d5   :  { %v1737_v39 = vadd.f32 1.0, %v2642_v32 }
0x21d6   :  { %2643 = vrcp.f32 %v1736_v11 }
0x21d7   :  { %2645 = vrcp.f32 %v1737_v39 }
0x21e3   :  { %v2644_v63 = vpop.eup %2643 }
0x21e4   :  { %v2646_v55 = vpop.eup %2645  ;;  %v1744_v8 = vmul.f32 %v2644_v63, %v1666_v1 }
0x21e5   :  { %v1745_v37 = vmul.f32 %v2646_v55, %v1667_v31 }
0x223f   :  { %v1749_v54 = vpop.permute.xlu1 %1748 }
0x2240   :  { %v1754_v17 = vmul.f32 %v2644_v63, %v1749_v54 }
0x2242   :  { %1758 = vrot.lane.b32.xlu1 %v1754_v17, %s2726_s5 }
0x2245   :  { %v1751_v52 = vpop.permute.xlu0 %1750 }
0x2246   :  { %v1755_v3 = vmul.f32 %v2646_v55, %v1751_v52 }
0x2248   :  { %1760 = vrot.lane.b32.xlu0 %v1755_v3, %s2726_s5 }
0x22b4   :  { %v1759_v9 = vpop.permute.xlu1 %1758 }
0x22b5   :  { %v1764_v10 = vadd.f32 %v1759_v9, %v1744_v8 }
0x22b7   :  { %2647 = vtanh.f32 %v1764_v10 }
0x22ba   :  { %v1761_v15 = vpop.permute.xlu0 %1760 }
0x22bb   :  { %v1765_v16 = vadd.f32 %v1761_v15, %v1745_v37 }
0x22bd   :  { %2649 = vtanh.f32 %v1765_v16 }
0x22c4   :  { %v2648_v14 = vpop.eup %2647 }
0x22c5   :  { %1770 = vrot.lane.b32.xlu1 %v2648_v14, %s2725_s0 }
0x22ca   :  { %v2650_v18 = vpop.eup %2649 }
0x22cb   :  { %1772 = vrot.lane.b32.xlu0 %v2650_v18, %s2725_s0 }
0x2337   :  { %v1771_v60 = vpop.permute.xlu1 %1770 }
0x2338   :  { %v1776_v27 = vmul.f32 %v2644_v63, %v1771_v60 }
0x233d   :  { %v1773_v35 = vpop.permute.xlu0 %1772 }
0x233e   :  { %v1777_v48 = vmul.f32 %v2646_v55, %v1773_v35 }
0x2340   :  { %v1778_v28 = vpack.c.bf16 %v1777_v48, %v1776_v27 }
0x2342   :  { %1780 = vrot.lane.b32.xlu1 %v1778_v28, %s2726_s5 }
0x23b4   :  { %v1781_v20 = vpop.permute.xlu1 %1780 }
0x23b5   :  { %2345 = vmatmul.mubr.msk.bf16.vlgmr.msra.gmra.mxu1 %vm210_vm1, %v1781_v20 }
0x23b6   :  { %1994 = vmatpush1.bf16.msra.mxu1 %v2977_v4  ;;  %2013 = vmatprep.mubr.bf16.mxu1 %v2724_v0 }
0x23b7   :  { %1995 = vmatprep.subr.bf16.mxu1 %v2986_v42 }
0x23ba   :  { %1996 = vmatpush1.bf16.msra.mxu1 %v2994_v45 }
0x2475   :  { %v1819_v13 = vpop.f32.mrf.mxu1 }
0x2476   :  { %v1826_v22 = vadd.f32 %v1819_v13, %v3053_v7 }
0x2477   :  { %v1821_v38 = vpop.f32.mrf.mxu1 }
0x2478   :  { %2651 = vtanh.f32 %v1826_v22  ;;  %v2346_v0 = vmul.f32 -1.442695, %v1826_v22 }
0x2479   :  { %v1822_v41 = vpop.f32.mrf.mxu1 }
0x247b   :  { %v1823_v23 = vpop.f32.mrf.mxu1 }
0x247c   :  { %v1827_v26 = vadd.f32 %v1823_v23, %v3043_v12 }
0x247e   :  { %2653 = vtanh.f32 %v1827_v26  ;;  %v2347_v42 = vmul.f32 -1.442695, %v1827_v26 }
0x247f   :  { %2655 = vpow2.f32 %v2346_v0 }
0x2480   :  { %2657 = vpow2.f32 %v2347_v42 }
0x2485   :  { %v2652_v47 = vpop.eup %2651 }
0x2486   :  { %1846 = vrot.lane.b32.xlu0 %v2652_v47, %s2725_s0 }
0x248b   :  { %v2654_v4 = vpop.eup %2653 }
0x248c   :  { %1848 = vrot.lane.b32.xlu1 %v2654_v4, %s2725_s0  ;;  %v2656_v45 = vpop.eup %2655 }
0x248d   :  { %v1834_v30 = vadd.f32 1.0, %v2656_v45  ;;  %v2658_v7 = vpop.eup %2657 }
0x248e   :  { %v1835_v1 = vadd.f32 1.0, %v2658_v7 }
0x248f   :  { %2659 = vrcp.f32 %v1834_v30 }
0x2490   :  { %2661 = vrcp.f32 %v1835_v1 }
0x249c   :  { %v2660_v34 = vpop.eup %2659 }
0x249d   :  { %v2662_v31 = vpop.eup %2661  ;;  %v1842_v44 = vmul.f32 %v2660_v34, %v1764_v10 }
0x249e   :  { %v1843_v46 = vmul.f32 %v2662_v31, %v1765_v16 }
0x24f8   :  { %v1847_v36 = vpop.permute.xlu0 %1846 }
0x24f9   :  { %v1852_v12 = vmul.f32 %v2660_v34, %v1847_v36 }
0x24fb   :  { %1856 = vrot.lane.b32.xlu0 %v1852_v12, %s2726_s5 }
0x24fe   :  { %v1849_v40 = vpop.permute.xlu1 %1848 }
0x24ff   :  { %v1853_v6 = vmul.f32 %v2662_v31, %v1849_v40 }
0x2501   :  { %1858 = vrot.lane.b32.xlu1 %v1853_v6, %s2726_s5 }
0x256d   :  { %v1857_v43 = vpop.permute.xlu0 %1856 }
0x256e   :  { %v1862_v19 = vadd.f32 %v1857_v43, %v1842_v44 }
0x2570   :  { %2663 = vtanh.f32 %v1862_v19 }
0x2573   :  { %v1859_v33 = vpop.permute.xlu1 %1858 }
0x2574   :  { %v1863_v49 = vadd.f32 %v1859_v33, %v1843_v46 }
0x2576   :  { %2665 = vtanh.f32 %v1863_v49 }
0x257d   :  { %v2664_v25 = vpop.eup %2663 }
0x257e   :  { %1868 = vrot.lane.b32.xlu0 %v2664_v25, %s2725_s0 }
0x2583   :  { %v2666_v51 = vpop.eup %2665 }
0x2584   :  { %1870 = vrot.lane.b32.xlu1 %v2666_v51, %s2725_s0 }
0x25f0   :  { %v1869_v61 = vpop.permute.xlu0 %1868 }
0x25f1   :  { %v1874_v24 = vmul.f32 %v2660_v34, %v1869_v61 }
0x25f6   :  { %v1871_v53 = vpop.permute.xlu1 %1870 }
0x25f7   :  { %v1875_v56 = vmul.f32 %v2662_v31, %v1871_v53 }
0x25f9   :  { %v1876_v50 = vpack.c.bf16 %v1875_v56, %v1874_v24  ;;  %v2437_v56 = vld [vmem:[%s3200_s2 + $0x8] sm:$0xff]  }
0x25fb   :  { %1878 = vrot.lane.b32.xlu0 %v1876_v50, %s2726_s5  ;;  %v2438_v50 = vld [vmem:[%s3200_s2 + $0x18] sm:$0xff]  }
0x266d   :  { %v1879_v58 = vpop.permute.xlu0 %1878 }
0x266e   :  { %2348 = vmatmul.mubr.msk.bf16.vlgmr.msra.gmra.mxu0 %vm210_vm1, %v1879_v58  ;;  %v2727_v58 = vmov 0.0  }
0x266f   :  { %2382 = vmatprep.subr.bf16.mxu1 %v2727_v58  ;;  %2374 = vmatprep.subr.bf16.mxu0 %v2727_v58 }
0x2670   :  { %2375 = vmatpush3.bf16.msra.mxu0 %v2438_v50  ;;  %2378 = vmatprep.mubr.msk.bf16.mxu0 %vm2728_vm3, %v2727_v58 }
0x2671   :  { %2376 = vmatprep.subr.bf16.mxu0 %v2727_v58 }
0x272e   :  { %v1917_v59 = vpop.f32.mrf.mxu0 }
0x272f   :  { %v1924_v62 = vadd.f32 %v1917_v59, %v3057_v29  ;;  %v2439_v59 = vld [vmem:[%s3200_s2] sm:$0xff]  }
0x2730   :  { %v1919_v21 = vpop.f32.mrf.mxu0 }
0x2731   :  { %2667 = vtanh.f32 %v1924_v62  ;;  %v2349_v17 = vmul.f32 -1.442695, %v1924_v62  ;;  %v2440_v62 = vld [vmem:[%s3200_s2 + $0x10] sm:$0xff]  }
0x2732   :  { %v1920_v11 = vpop.f32.mrf.mxu0  ;;  %2377 = vmatpush3.bf16.msra.mxu0 %v2440_v62 }
0x2733   :  { %2390 = vmatprep.subr.bf16.mxu0 %v2727_v58 }
0x2734   :  { %v1921_v32 = vpop.f32.mrf.mxu0 }
0x2735   :  { %v1925_v39 = vadd.f32 %v1921_v32, %v3039_v2 }
0x2737   :  { %2669 = vtanh.f32 %v1925_v39  ;;  %v2350_v55 = vmul.f32 -1.442695, %v1925_v39 }
0x2738   :  { %2671 = vpow2.f32 %v2349_v17 }
0x2739   :  { %2673 = vpow2.f32 %v2350_v55 }
0x273e   :  { %v2668_v63 = vpop.eup %2667 }
0x273f   :  { %1944 = vrot.lane.b32.xlu1 %v2668_v63, %s2725_s0 }
0x2744   :  { %v2670_v54 = vpop.eup %2669 }
0x2745   :  { %1946 = vrot.lane.b32.xlu0 %v2670_v54, %s2725_s0  ;;  %v2672_v52 = vpop.eup %2671 }
0x2746   :  { %v1932_v3 = vadd.f32 1.0, %v2672_v52  ;;  %v2674_v29 = vpop.eup %2673 }
0x2747   :  { %v1933_v8 = vadd.f32 1.0, %v2674_v29  ;;  %v2442_v29 = vld [vmem:[%s3200_s2 + $0x20] sm:$0xff]  }
0x2748   :  { %2675 = vrcp.f32 %v1932_v3  ;;  %v2441_v3 = vld [vmem:[%s3200_s2 + $0x28] sm:$0xff]  }
0x2749   :  { %2677 = vrcp.f32 %v1933_v8 }
0x2755   :  { %v2676_v9 = vpop.eup %2675 }
0x2756   :  { %v2678_v37 = vpop.eup %2677  ;;  %v1940_v14 = vmul.f32 %v2676_v9, %v1862_v19 }
0x2757   :  { %v1941_v35 = vmul.f32 %v2678_v37, %v1863_v49 }
0x27b1   :  { %v1945_v10 = vpop.permute.xlu1 %1944 }
0x27b2   :  { %v1950_v2 = vmul.f32 %v2676_v9, %v1945_v10 }
0x27b4   :  { %1954 = vrot.lane.b32.xlu1 %v1950_v2, %s2726_s5 }
0x27b7   :  { %v1947_v15 = vpop.permute.xlu0 %1946 }
0x27b8   :  { %v1951_v16 = vmul.f32 %v2678_v37, %v1947_v15 }
0x27ba   :  { %1956 = vrot.lane.b32.xlu0 %v1951_v16, %s2726_s5 }
0x2826   :  { %v1955_v18 = vpop.permute.xlu1 %1954 }
0x2827   :  { %v1960_v60 = vadd.f32 %v1955_v18, %v1940_v14 }
0x2829   :  { %2679 = vtanh.f32 %v1960_v60 }
0x282c   :  { %v1957_v27 = vpop.permute.xlu0 %1956 }
0x282d   :  { %v1961_v48 = vadd.f32 %v1957_v27, %v1941_v35 }
0x282f   :  { %2681 = vtanh.f32 %v1961_v48 }
0x2836   :  { %v2680_v28 = vpop.eup %2679 }
0x2837   :  { %1966 = vrot.lane.b32.xlu1 %v2680_v28, %s2725_s0  ;;  %v2361_v28 = vld [vmem:[%s3201_s3 + $0x3] ss:$0 sm:$0xff] }
0x283c   :  { %v2682_v20 = vpop.eup %2681 }
0x283d   :  { %1968 = vrot.lane.b32.xlu0 %v2682_v20, %s2725_s0 }
0x28a9   :  { %v1967_v13 = vpop.permute.xlu1 %1966 }
0x28aa   :  { %v1972_v38 = vmul.f32 %v2676_v9, %v1967_v13  ;;  %v2360_v9 = vld [vmem:[%s3201_s3 + $0x2] ss:$0 sm:$0xff] }
0x28af   :  { %v1969_v22 = vpop.permute.xlu0 %1968 }
0x28b0   :  { %v1973_v41 = vmul.f32 %v2678_v37, %v1969_v22 }
0x28b2   :  { %v1974_v23 = vpack.c.bf16 %v1973_v41, %v1972_v38 }
0x28b4   :  { %1976 = vrot.lane.b32.xlu1 %v1974_v23, %s2726_s5 }
0x2926   :  { %v1977_v26 = vpop.permute.xlu1 %1976 }
0x2927   :  { %2351 = vmatmul.mubr.msk.bf16.vlgmr.msra.gmra.mxu1 %vm210_vm1, %v1977_v26 }
0x2928   :  { %2383 = vmatpush3.bf16.msra.mxu1 %v2437_v56  ;;  %2386 = vmatprep.mubr.msk.bf16.mxu1 %vm2728_vm3, %v2727_v58 }
0x2929   :  { %2384 = vmatprep.subr.bf16.mxu1 %v2727_v58 }
0x292c   :  { %2385 = vmatpush3.bf16.msra.mxu1 %v2439_v59 }
0x29e7   :  { %v2015_v47 = vpop.f32.mrf.mxu1 }
0x29e8   :  { %v2022_v4 = vadd.f32 %v2015_v47, %v3061_v57 }
0x29e9   :  { %v2017_v0 = vpop.f32.mrf.mxu1 }
0x29ea   :  { %2683 = vtanh.f32 %v2022_v4  ;;  %v2352_v34 = vmul.f32 -1.442695, %v2022_v4 }
0x29eb   :  { %v2018_v42 = vpop.f32.mrf.mxu1 }
0x29ed   :  { %v2019_v45 = vpop.f32.mrf.mxu1 }
0x29ee   :  { %v2023_v30 = vadd.f32 %v2019_v45, %v3035_v5 }
0x29f0   :  { %2685 = vtanh.f32 %v2023_v30  ;;  %v2353_v36 = vmul.f32 -1.442695, %v2023_v30 }
0x29f1   :  { %2687 = vpow2.f32 %v2352_v34 }
0x29f2   :  { %2689 = vpow2.f32 %v2353_v36 }
0x29f7   :  { %v2684_v7 = vpop.eup %2683 }
0x29f8   :  { %2042 = vrot.lane.b32.xlu0 %v2684_v7, %s2725_s0 }
0x29fd   :  { %v2686_v1 = vpop.eup %2685 }
0x29fe   :  { %2044 = vrot.lane.b32.xlu1 %v2686_v1, %s2725_s0  ;;  %v2688_v12 = vpop.eup %2687 }
0x29ff   :  { %v2030_v31 = vadd.f32 1.0, %v2688_v12  ;;  %v2690_v57 = vpop.eup %2689 }
0x2a00   :  { %v2031_v40 = vadd.f32 1.0, %v2690_v57 }
0x2a01   :  { %2691 = vrcp.f32 %v2030_v31 }
0x2a02   :  { %2693 = vrcp.f32 %v2031_v40 }
0x2a0e   :  { %v2692_v6 = vpop.eup %2691 }
0x2a0f   :  { %v2694_v43 = vpop.eup %2693  ;;  %v2038_v33 = vmul.f32 %v2692_v6, %v1960_v60 }
0x2a10   :  { %v2039_v51 = vmul.f32 %v2694_v43, %v1961_v48 }
0x2a6a   :  { %v2043_v44 = vpop.permute.xlu0 %2042 }
0x2a6b   :  { %v2048_v5 = vmul.f32 %v2692_v6, %v2043_v44 }
0x2a6d   :  { %2052 = vrot.lane.b32.xlu0 %v2048_v5, %s2726_s5 }
0x2a70   :  { %v2045_v19 = vpop.permute.xlu1 %2044 }
0x2a71   :  { %v2049_v46 = vmul.f32 %v2694_v43, %v2045_v19 }
0x2a73   :  { %2054 = vrot.lane.b32.xlu1 %v2049_v46, %s2726_s5 }
0x2adf   :  { %v2053_v49 = vpop.permute.xlu0 %2052 }
0x2ae0   :  { %v2058_v25 = vadd.f32 %v2053_v49, %v2038_v33 }
0x2ae2   :  { %2695 = vtanh.f32 %v2058_v25 }
0x2ae5   :  { %v2055_v61 = vpop.permute.xlu1 %2054 }
0x2ae6   :  { %v2059_v53 = vadd.f32 %v2055_v61, %v2039_v51 }
0x2ae8   :  { %2697 = vtanh.f32 %v2059_v53 }
0x2aef   :  { %v2696_v24 = vpop.eup %2695 }
0x2af0   :  { %2064 = vrot.lane.b32.xlu0 %v2696_v24, %s2725_s0 }
0x2af5   :  { %v2698_v21 = vpop.eup %2697 }
0x2af6   :  { %2066 = vrot.lane.b32.xlu1 %v2698_v21, %s2725_s0 }
0x2b62   :  { %v2065_v11 = vpop.permute.xlu0 %2064 }
0x2b63   :  { %v2070_v39 = vmul.f32 %v2692_v6, %v2065_v11 }
0x2b68   :  { %v2067_v32 = vpop.permute.xlu1 %2066 }
0x2b69   :  { %v2071_v63 = vmul.f32 %v2694_v43, %v2067_v32 }
0x2b6b   :  { %v2072_v54 = vpack.c.bf16 %v2071_v63, %v2070_v39 }
0x2b6d   :  { %v2082_v17 = vrot.slane %v2072_v54, 4  ;;  %2140 = vrot.lane.b32.xlu1 %v2072_v54, %s2726_s5 }
0x2b6f   :  { %2083 = vrot.lane.b32.xlu0 %v2082_v17, %s2726_s5 }
0x2bdf   :  { %v2141_v55 = vpop.permute.xlu1 %2140 }
0x2be0   :  { %2387 = vmatmul.mubr.msk.bf16.vlgmr.msra.gmra.mxu1 %vm210_vm1, %v2141_v55 }
0x2be1   :  { %v2084_v52 = vpop.permute.xlu0 %2083 }
0x2be2   :  { %2379 = vmatmul.mubr.msk.bf16.vlgmr.msra.gmra.mxu0 %vm210_vm1, %v2084_v52 }
0x2be3   :  { %2394 = vmatprep.mubr.msk.bf16.mxu0 %vm2728_vm3, %v2727_v58  ;;  %2391 = vmatpush3.bf16.msra.mxu0 %v2441_v3 }
0x2be4   :  { %2392 = vmatprep.subr.bf16.mxu0 %v2727_v58 }
0x2be7   :  { %2393 = vmatpush3.bf16.msra.mxu0 %v2442_v29 }
0x2ca0   :  { %v2191_v8 = vpop.f32.mrf.mxu1 }
0x2ca2   :  { %v2134_v10 = vpop.f32.mrf.mxu0  ;;  %v2388_v2 = vpop.f32.mrf.mxu1 }
0x2ca3   :  { %v2192_v37 = vadd.f32 %v2191_v8, %v2134_v10 }
0x2ca4   :  { %v2380_v15 = vpop.f32.mrf.mxu0  ;;  %v2194_v16 = vpop.f32.mrf.mxu1 }
0x2ca5   :  { %v2201_v14 = vadd.f32 %v2360_v9, %v2192_v37 }
0x2ca6   :  { %v2137_v18 = vpop.f32.mrf.mxu0  ;;  %v2389_v60 = vpop.f32.mrf.mxu1 }
0x2ca7   :  { %v2202_v35 = vmax.f32 %v2201_v14, 0.0 }
0x2ca8   :  { %v2381_v27 = vpop.f32.mrf.mxu0 }
0x2ca9   :  { %v2203_v48 = vpack.c.bf16 %v2202_v35, %v2202_v35 }
0x2cab   :  { %2395 = vmatmul.mubr.msk.bf16.vlgmr.msra.gmra.mxu0 %vm210_vm1, %v2203_v48 }
0x2d6b   :  { %v2261_v20 = vpop.f32.mrf.mxu0 }
0x2d6c   :  { %v2262_v13 = vadd.f32 %v2361_v28, %v2261_v20 }
0x2d6d   :  { %v2396_v22 = vpop.f32.mrf.mxu0 }
0x2d6e   :  { %2267 = vst.msk [vmem:[%s3202_s4] sm:$0xff] %vm210_vm1, %v2262_v13 }
0x2d6f   :  { %v2264_v38 = vpop.f32.mrf.mxu0 }
0x2d71   :  { %v2397_v41 = vpop.f32.mrf.mxu0 }
0x2d72   :  { %2272 = vsyncpa [#allocation3], 1 }

</bundles_post_ra>
